<compile_context>
chip_gen: v7x
topology: tpu7x:2x2x1
jax: 0.10.0
libtpu: 0.0.40
codegen_flags: <defaults>
</compile_context>

<pallas_src>
import jax
import jax.numpy as jnp
import numpy as np
from jax.experimental import pallas as pl
from jax.experimental.pallas import tpu as pltpu

EPS = 1e-5
_HIGHEST = jax.lax.Precision.HIGHEST

# 3x3 tap offsets in row-major order; tap index = ky*3 + kx matches both the
# precomputed mask rows and the stacked per-tap conv2 weight slabs.
_TAPS = tuple((ky - 1, kx - 1) for ky in range(3) for kx in range(3))


def _make_kernel(has_skip, b_tile, Cin, Cmid, Cout, H, W):
    """Kernel specialized on skip-type, batch-fold factor and spatial size."""
    HW = H * W
    L = b_tile * HW

    def kernel(x_ref, vec_ref, msk_ref, w1_ref, w2_ref, w3_ref, *rest):
        if has_skip:
            wsk_ref, o_ref = rest
        else:
            (o_ref,) = rest

        # ---- gather b_tile per-image (Cin, HW) slabs side by side on lanes
        # -> one lane-dense (Cin, b_tile*HW) working matrix for this step.
        if b_tile == 1:
            x = x_ref[0].astype(jnp.float32)
        else:
            x = jnp.concatenate(
                [x_ref[b].astype(jnp.float32) for b in range(b_tile)], axis=1)

        # ---- packed per-channel vectors (one tiny grid-invariant operand)
        vec = vec_ref[...]
        s1 = vec[:Cin, 0:1]           # bn1 scale
        t1 = vec[:Cin, 1:2]           # bn1 shift
        b1 = vec[:Cmid, 2:3]          # conv1 bias (bn2 folded)
        b2 = vec[:Cmid, 3:4]          # conv2 bias (bn3 folded)
        cb = vec[:Cout, 4:5]          # conv3 bias (+ skip bias)

        # ---- skip path: reads the raw input (per the reference module).
        if has_skip:
            res = jnp.dot(wsk_ref[...], x, preferred_element_type=jnp.float32,
                          precision=_HIGHEST)
        else:
            res = x

        # ---- bn1 + relu (per-channel affine, lane-dense)
        a = jnp.maximum(x * s1 + t1, 0.0)

        # ---- conv1 (1x1, bn2 folded) + relu
        h = jnp.dot(w1_ref[...], a, preferred_element_type=jnp.float32,
                    precision=_HIGHEST)
        h = jnp.maximum(h + b1, 0.0)                      # (Cmid, L)

        # ---- conv2 (3x3, pad=1, bn3 folded) + relu
        # Roll-based im2col, accumulated tap-by-tap.  Masks are precomputed
        # per-image (lane % HW) f32 constants, so roll wrap-around and
        # cross-image leakage land only on zeroed lanes.
        g = None
        for tap, (dy, dx) in enumerate(_TAPS):
            s = dy * W + dx
            t = h if s == 0 else pltpu.roll(h, (-s) % L, 1)
            if dy != 0 or dx != 0:
                t = t * msk_ref[pl.ds(tap, 1), :]          # (1, L) broadcast
            d = jnp.dot(w2_ref[tap], t, preferred_element_type=jnp.float32,
                        precision=_HIGHEST)
            g = d if g is None else g + d
        g = jnp.maximum(g + b2, 0.0)                       # (Cmid, L)

        # ---- conv3 (1x1) + combined bias + residual
        out = jnp.dot(w3_ref[...], g, preferred_element_type=jnp.float32,
                      precision=_HIGHEST)
        out = out + cb + res
        if b_tile == 1:
            o_ref[0] = out.astype(o_ref.dtype)
        else:
            for b in range(b_tile):                        # HW % 128 == 0 -> aligned lane slices
                o_ref[b] = out[:, b * HW:(b + 1) * HW].astype(o_ref.dtype)

    return kernel


def _fold_params(p, has_skip):
    """Fold BN running stats into affines, then fold the affines/biases into
    adjacent conv weights; pack all per-channel vectors into one constant."""
    f32 = jnp.float32

    def bn_affine(prefix):
        s = p[prefix + "_gamma"] / jnp.sqrt(p[prefix + "_var"] + EPS)
        t = p[prefix + "_beta"] - p[prefix + "_mean"] * s
        return s, t

    s1, t1 = bn_affine("bn1")
    s2, t2 = bn_affine("bn2")
    s3, t3 = bn_affine("bn3")

    w1 = p["conv1_w"][:, :, 0, 0]                       # (Cmid, Cin)
    w3 = p["conv3_w"][:, :, 0, 0]                       # (Cout, Cmid)
    cmid, cin = w1.shape
    cout = w3.shape[0]

    # bn2 after conv1 (both linear, before the relu):  s2*(W1 a + c1) + t2
    w1f = (w1 * s2[:, None]).astype(f32)
    b1f = s2 * p["conv1_b"] + t2
    # bn3 after conv2:  s3*(W2 h + c2) + t3 ; per-tap (ky,kx) weight slabs,
    # tap index = ky*3 + kx, matching _TAPS / the mask rows.
    w2f = p["conv2_w"] * s3[:, None, None, None]        # (Cmid, Cmid, 3, 3)
    w2s = jnp.transpose(w2f, (2, 3, 0, 1)).reshape(9, cmid, cmid).astype(f32)
    b2f = s3 * p["conv2_b"] + t3
    # conv3 bias and skip bias land on the same output -> one combined add.
    cb = p["conv3_b"] + (p["skip_b"] if has_skip else 0.0)

    cpad = max(cin, cmid, cout)

    def pad_col(v):
        v = jnp.asarray(v, f32).reshape(-1)
        return jnp.pad(v, (0, cpad - v.shape[0]))

    # columns: [bn1 scale, bn1 shift, conv1 bias, conv2 bias, conv3(+skip) bias]
    vec = jnp.stack([pad_col(s1), pad_col(t1), pad_col(b1f),
                     pad_col(b2f), pad_col(cb)], axis=1)  # (cpad, 5)

    consts = [vec, w1f, w2s, w3.astype(f32)]
    if has_skip:
        consts.append(p["skip_w"][:, :, 0, 0].astype(f32))  # (Cout, Cin)
    return consts


def _tap_masks(H, W, b_tile):
    """(9, b_tile*H*W) f32 border masks, one row per 3x3 tap, computed from
    the per-image flattened position so batch-folded lanes mask correctly."""
    HW = H * W
    L = b_tile * HW
    pos = np.arange(L) % HW
    yy, xx = pos // W, pos % W
    rows = []
    for dy, dx in _TAPS:
        m = np.ones(L, np.float32)
        if dy == -1:
            m = m * (yy >= 1)
        elif dy == 1:
            m = m * (yy <= H - 2)
        if dx == -1:
            m = m * (xx >= 1)
        elif dx == 1:
            m = m * (xx <= W - 2)
        rows.append(m.astype(np.float32))
    return jnp.asarray(np.stack(rows, axis=0))


def _choose_b_tile(N, HW, max_lanes=4096):
    """Fold several images onto the lane axis per grid step (amortizes the
    ~0.35us per-step overhead, enlarges DMAs), but keep >= 2 grid steps when
    possible so both v7x TensorCores get work."""
    if HW % 128 != 0:
        return 1
    best = 1
    for bt in range(1, N + 1):
        if N % bt:
            continue
        if N >= 2 and N // bt < 2:
            continue
        if bt * HW > max_lanes:
            continue
        best = bt
    return best


def _vmem_limit_bytes():
    """Size the scoped-VMEM request per generation (v5e/v6e 128 MiB physical,
    v7x 64 MiB) instead of a fixed constant."""
    try:
        cap = pltpu.get_tpu_info().vmem_capacity_bytes
    except Exception:
        cap = 64 * 1024 * 1024
    return int(min(cap // 2, 64 * 1024 * 1024))


def residual_forward(x_nchw, p):
    N, Cin, H, W = x_nchw.shape
    Cmid = p["conv1_w"].shape[0]
    Cout = p["conv3_w"].shape[0]
    has_skip = p["skip_w"] is not None
    if not has_skip:
        assert Cin == Cout, "identity skip requires in_channels == out_channels"
    # Border-mask / roll equivalence is verified for 3x3, pad=1, stride=1 only.
    assert H >= 3 and W >= 3, "spatial dims must be >= 3 for the rolled 3x3 conv"

    HW = H * W
    b_tile = _choose_b_tile(N, HW)
    steps = N // b_tile

    # NCHW viewed as per-image (C, H*W) matrices: free reshape, no transpose.
    # Input/output dtype is passed through (bf16 I/O halves HBM traffic;
    # compute is f32 inside the kernel either way).
    x = x_nchw.reshape(N, Cin, HW)
    consts = _fold_params(p, has_skip)
    masks = _tap_masks(H, W, b_tile)
    vec, w1f, w2s, w3f = consts[:4]

    def full(shape):
        return pl.BlockSpec(shape, lambda n: (0,) * len(shape))

    in_specs = [
        pl.BlockSpec((b_tile, Cin, HW), lambda n: (n, 0, 0)),   # x: b_tile images
        full(vec.shape),                                        # packed bn1/bias vectors
        full(masks.shape),                                      # per-tap border masks
        full(w1f.shape),                                        # conv1 (+bn2)
        full(w2s.shape),                                        # conv2 per-tap slabs (+bn3)
        full(w3f.shape),                                        # conv3
    ]
    operands = [x, vec, masks, w1f, w2s, w3f]
    if has_skip:
        in_specs.append(full(consts[4].shape))                  # skip 1x1 conv
        operands.append(consts[4])

    # Advisory cost estimate so XLA schedules neighbouring ops sensibly.
    flops = 2 * N * HW * (Cin * Cmid + 9 * Cmid * Cmid + Cmid * Cout
                          + (Cin * Cout if has_skip else 0))
    const_bytes = 4 * sum(int(np.prod(a.shape)) for a in operands[1:])
    io_bytes = x.dtype.itemsize * N * HW * (Cin + Cout)

    out = pl.pallas_call(
        _make_kernel(has_skip, b_tile, Cin, Cmid, Cout, H, W),
        out_shape=jax.ShapeDtypeStruct((N, Cout, HW), x_nchw.dtype),
        grid=(steps,),
        in_specs=in_specs,
        out_specs=pl.BlockSpec((b_tile, Cout, HW), lambda n: (n, 0, 0)),
        compiler_params=pltpu.CompilerParams(
            dimension_semantics=("parallel",),   # independent batch steps -> both v7x TCs
            vmem_limit_bytes=_vmem_limit_bytes()),
        cost_estimate=pl.CostEstimate(flops=flops, transcendentals=0,
                                      bytes_accessed=io_bytes + const_bytes),
    )(*operands)

    return out.reshape(N, Cout, H, W)


def init_params(key, in_channels, out_channels):
    cmid = out_channels // 2
    ks = jax.random.split(key, 20)
    f32 = jnp.float32
    p = {
        "bn1_gamma": jax.random.uniform(ks[0], (in_channels,), f32, 0.5, 1.5),
        "bn1_beta": 0.1 * jax.random.normal(ks[1], (in_channels,), f32),
        "bn1_mean": 0.1 * jax.random.normal(ks[2], (in_channels,), f32),
        "bn1_var": jax.random.uniform(ks[3], (in_channels,), f32, 0.5, 1.5),
        "conv1_w": 0.3 * jax.random.normal(ks[4], (cmid, in_channels, 1, 1), f32),
        "conv1_b": 0.1 * jax.random.normal(ks[5], (cmid,), f32),
        "bn2_gamma": jax.random.uniform(ks[6], (cmid,), f32, 0.5, 1.5),
        "bn2_beta": 0.1 * jax.random.normal(ks[7], (cmid,), f32),
        "bn2_mean": 0.1 * jax.random.normal(ks[8], (cmid,), f32),
        "bn2_var": jax.random.uniform(ks[9], (cmid,), f32, 0.5, 1.5),
        "conv2_w": 0.3 * jax.random.normal(ks[10], (cmid, cmid, 3, 3), f32),
        "conv2_b": 0.1 * jax.random.normal(ks[11], (cmid,), f32),
        "bn3_gamma": jax.random.uniform(ks[12], (cmid,), f32, 0.5, 1.5),
        "bn3_beta": 0.1 * jax.random.normal(ks[13], (cmid,), f32),
        "bn3_mean": 0.1 * jax.random.normal(ks[14], (cmid,), f32),
        "bn3_var": jax.random.uniform(ks[15], (cmid,), f32, 0.5, 1.5),
        "conv3_w": 0.3 * jax.random.normal(ks[16], (out_channels, cmid, 1, 1), f32),
        "conv3_b": 0.1 * jax.random.normal(ks[17], (out_channels,), f32),
    }
    if in_channels != out_channels:
        p["skip_w"] = 0.3 * jax.random.normal(ks[18], (out_channels, in_channels, 1, 1), f32)
        p["skip_b"] = 0.1 * jax.random.normal(ks[19], (out_channels,), f32)
    else:
        p["skip_w"] = None
        p["skip_b"] = None
    return p


def reference_forward(x, p):
    """Pure-JAX NCHW reference matching PyTorch eval-mode forward (f32-accurate)."""
    def bn(h, g, b, m, v):
        g, b, m, v = (a[None, :, None, None] for a in (g, b, m, v))
        return (h - m) / jnp.sqrt(v + EPS) * g + b

    def conv(h, w, b, pad):
        y = jax.lax.conv_general_dilated(
            h, w, (1, 1), [(pad, pad), (pad, pad)],
            dimension_numbers=("NCHW", "OIHW", "NCHW"), precision=_HIGHEST)
        return y + b[None, :, None, None]

    res = x if p["skip_w"] is None else conv(x, p["skip_w"], p["skip_b"], 0)
    h = jax.nn.relu(bn(x, p["bn1_gamma"], p["bn1_beta"], p["bn1_mean"], p["bn1_var"]))
    h = conv(h, p["conv1_w"], p["conv1_b"], 0)
    h = jax.nn.relu(bn(h, p["bn2_gamma"], p["bn2_beta"], p["bn2_mean"], p["bn2_var"]))
    h = conv(h, p["conv2_w"], p["conv2_b"], 1)
    h = jax.nn.relu(bn(h, p["bn3_gamma"], p["bn3_beta"], p["bn3_mean"], p["bn3_var"]))
    h = conv(h, p["conv3_w"], p["conv3_b"], 0)
    return h + res


if __name__ == "__main__":
    key = jax.random.PRNGKey(0)
    kx1, kp1, kx2, kp2, kx3, kp3 = jax.random.split(key, 6)

    # Config 1: in_channels != out_channels -> 1x1 skip-conv path (2 grid steps).
    N, Cin, H, W = 2, 4, 16, 16
    Cout = 8
    x1 = jax.random.normal(kx1, (N, Cin, H, W), jnp.float32)
    p1 = init_params(kp1, Cin, Cout)
    out1 = jax.block_until_ready(residual_forward(x1, p1))
    assert out1.shape == (N, Cout, H, W), out1.shape
    np.testing.assert_allclose(np.asarray(out1), np.asarray(reference_forward(x1, p1)),
                               rtol=1e-4, atol=1e-4)

    # Config 2: in_channels == out_channels -> identity-skip specialization.
    x2 = jax.random.normal(kx2, (N, 8, H, W), jnp.float32)
    p2 = init_params(kp2, 8, 8)
    out2 = jax.block_until_ready(residual_forward(x2, p2))
    assert out2.shape == (N, 8, H, W), out2.shape
    np.testing.assert_allclose(np.asarray(out2), np.asarray(reference_forward(x2, p2)),
                               rtol=1e-4, atol=1e-4)

    # Config 3: larger batch -> several images folded onto the lane axis per
    # grid step (b_tile > 1) while keeping 2 parallel steps for v7x's 2 TCs.
    x3 = jax.random.normal(kx3, (8, Cin, H, W), jnp.float32)
    p3 = init_params(kp3, Cin, Cout)
    out3 = jax.block_until_ready(residual_forward(x3, p3))
    assert out3.shape == (8, Cout, H, W), out3.shape
    np.testing.assert_allclose(np.asarray(out3), np.asarray(reference_forward(x3, p3)),
                               rtol=1e-4, atol=1e-4)

    print("KERNEL_OK")
</pallas_src>

<mosaic_0001>
module attributes {stable_mosaic.version = 11 : i64} {
  func.func @kernel(%arg0: i32, %arg1: memref<1x4x256xf32, #tpu.memory_space<vmem>>, %arg2: memref<8x5xf32, #tpu.memory_space<vmem>>, %arg3: memref<9x256xf32, #tpu.memory_space<vmem>>, %arg4: memref<4x4xf32, #tpu.memory_space<vmem>>, %arg5: memref<9x4x4xf32, #tpu.memory_space<vmem>>, %arg6: memref<8x4xf32, #tpu.memory_space<vmem>>, %arg7: memref<8x4xf32, #tpu.memory_space<vmem>>, %arg8: memref<1x8x256xf32, #tpu.memory_space<vmem>>) attributes {dimension_semantics = [#tpu.dimension_semantics<parallel>], iteration_bounds = array<i64: 2>, scalar_prefetch = 0 : i64, scratch_operands = 0 : i64, tpu.core_type = #tpu.core_type<tc>, window_params = [{transform_indices = @transform_0, window_bounds = array<i64: 1, 4, 256>}, {pipeline_mode = #tpu.pipeline_mode<synchronous>, transform_indices = @transform_1, window_bounds = array<i64: 8, 5>}, {pipeline_mode = #tpu.pipeline_mode<synchronous>, transform_indices = @transform_2, window_bounds = array<i64: 9, 256>}, {pipeline_mode = #tpu.pipeline_mode<synchronous>, transform_indices = @transform_3, window_bounds = array<i64: 4, 4>}, {pipeline_mode = #tpu.pipeline_mode<synchronous>, transform_indices = @transform_4, window_bounds = array<i64: 9, 4, 4>}, {pipeline_mode = #tpu.pipeline_mode<synchronous>, transform_indices = @transform_5, window_bounds = array<i64: 8, 4>}, {pipeline_mode = #tpu.pipeline_mode<synchronous>, transform_indices = @transform_6, window_bounds = array<i64: 8, 4>}, {transform_indices = @transform_7, window_bounds = array<i64: 1, 8, 256>}]} {
    %c0 = arith.constant 0 : index
    %c0_0 = arith.constant 0 : index
    %c0_1 = arith.constant 0 : index
    %0 = vector.load %arg1[%c0, %c0_0, %c0_1] : memref<1x4x256xf32, #tpu.memory_space<vmem>>, vector<1x4x256xf32>
    %1 = vector.shape_cast %0 : vector<1x4x256xf32> to vector<4x256xf32>
    %c0_2 = arith.constant 0 : index
    %c0_3 = arith.constant 0 : index
    %2 = vector.load %arg2[%c0_2, %c0_3] : memref<8x5xf32, #tpu.memory_space<vmem>>, vector<8x5xf32>
    %3 = vector.extract_strided_slice %2 {offsets = [0, 0], sizes = [4, 1], strides = [1, 1]} : vector<8x5xf32> to vector<4x1xf32>
    %4 = vector.extract_strided_slice %2 {offsets = [0, 1], sizes = [4, 1], strides = [1, 1]} : vector<8x5xf32> to vector<4x1xf32>
    %5 = vector.extract_strided_slice %2 {offsets = [0, 2], sizes = [4, 1], strides = [1, 1]} : vector<8x5xf32> to vector<4x1xf32>
    %6 = vector.extract_strided_slice %2 {offsets = [0, 3], sizes = [4, 1], strides = [1, 1]} : vector<8x5xf32> to vector<4x1xf32>
    %7 = vector.extract_strided_slice %2 {offsets = [0, 4], sizes = [8, 1], strides = [1, 1]} : vector<8x5xf32> to vector<8x1xf32>
    %c0_4 = arith.constant 0 : index
    %c0_5 = arith.constant 0 : index
    %8 = vector.load %arg7[%c0_4, %c0_5] : memref<8x4xf32, #tpu.memory_space<vmem>>, vector<8x4xf32>
    %cst = arith.constant dense<0.000000e+00> : vector<8x256xf32>
    %9 = tpu.matmul %8, %1, %cst {dimension_numbers = #tpu.dot_dimension_numbers<[1], [0], [0], [1], [0, 0, 1, 1], [], []>, precision = #tpu.contract_precision<fp32>} : vector<8x4xf32>, vector<4x256xf32>, vector<8x256xf32> -> vector<8x256xf32>
    %10 = vector.broadcast %3 : vector<4x1xf32> to vector<4x256xf32>
    %11 = arith.mulf %1, %10 : vector<4x256xf32>
    %12 = vector.broadcast %4 : vector<4x1xf32> to vector<4x256xf32>
    %13 = arith.addf %11, %12 : vector<4x256xf32>
    %cst_6 = arith.constant 0.000000e+00 : f32
    %14 = vector.broadcast %cst_6 : f32 to vector<4x256xf32>
    %15 = arith.maximumf %13, %14 : vector<4x256xf32>
    %c0_7 = arith.constant 0 : index
    %c0_8 = arith.constant 0 : index
    %16 = vector.load %arg4[%c0_7, %c0_8] : memref<4x4xf32, #tpu.memory_space<vmem>>, vector<4x4xf32>
    %cst_9 = arith.constant dense<0.000000e+00> : vector<4x256xf32>
    %17 = tpu.matmul %16, %15, %cst_9 {dimension_numbers = #tpu.dot_dimension_numbers<[1], [0], [0], [1], [0, 0, 1, 1], [], []>, precision = #tpu.contract_precision<fp32>} : vector<4x4xf32>, vector<4x256xf32>, vector<4x256xf32> -> vector<4x256xf32>
    %18 = vector.broadcast %5 : vector<4x1xf32> to vector<4x256xf32>
    %19 = arith.addf %17, %18 : vector<4x256xf32>
    %cst_10 = arith.constant 0.000000e+00 : f32
    %20 = vector.broadcast %cst_10 : f32 to vector<4x256xf32>
    %21 = arith.maximumf %19, %20 : vector<4x256xf32>
    %c17_i32 = arith.constant 17 : i32
    %22 = tpu.dynamic_rotate %21 by %c17_i32 dim 1 : vector<4x256xf32>, i32 -> vector<4x256xf32>
    %c0_11 = arith.constant 0 : index
    %c0_12 = arith.constant 0 : index
    %23 = vector.load %arg3[%c0_11, %c0_12] : memref<9x256xf32, #tpu.memory_space<vmem>>, vector<1x256xf32>
    %24 = vector.broadcast %23 : vector<1x256xf32> to vector<4x256xf32>
    %25 = arith.mulf %22, %24 : vector<4x256xf32>
    %c0_13 = arith.constant 0 : index
    %c0_14 = arith.constant 0 : index
    %c0_15 = arith.constant 0 : index
    %26 = vector.load %arg5[%c0_13, %c0_14, %c0_15] : memref<9x4x4xf32, #tpu.memory_space<vmem>>, vector<1x4x4xf32>
    %27 = vector.shape_cast %26 : vector<1x4x4xf32> to vector<4x4xf32>
    %cst_16 = arith.constant dense<0.000000e+00> : vector<4x256xf32>
    %28 = tpu.matmul %27, %25, %cst_16 {dimension_numbers = #tpu.dot_dimension_numbers<[1], [0], [0], [1], [0, 0, 1, 1], [], []>, precision = #tpu.contract_precision<fp32>} : vector<4x4xf32>, vector<4x256xf32>, vector<4x256xf32> -> vector<4x256xf32>
    %c16_i32 = arith.constant 16 : i32
    %29 = tpu.dynamic_rotate %21 by %c16_i32 dim 1 : vector<4x256xf32>, i32 -> vector<4x256xf32>
    %c1 = arith.constant 1 : index
    %c0_17 = arith.constant 0 : index
    %30 = vector.load %arg3[%c1, %c0_17] : memref<9x256xf32, #tpu.memory_space<vmem>>, vector<1x256xf32>
    %31 = vector.broadcast %30 : vector<1x256xf32> to vector<4x256xf32>
    %32 = arith.mulf %29, %31 : vector<4x256xf32>
    %c1_18 = arith.constant 1 : index
    %c0_19 = arith.constant 0 : index
    %c0_20 = arith.constant 0 : index
    %33 = vector.load %arg5[%c1_18, %c0_19, %c0_20] : memref<9x4x4xf32, #tpu.memory_space<vmem>>, vector<1x4x4xf32>
    %34 = vector.shape_cast %33 : vector<1x4x4xf32> to vector<4x4xf32>
    %cst_21 = arith.constant dense<0.000000e+00> : vector<4x256xf32>
    %35 = tpu.matmul %34, %32, %cst_21 {dimension_numbers = #tpu.dot_dimension_numbers<[1], [0], [0], [1], [0, 0, 1, 1], [], []>, precision = #tpu.contract_precision<fp32>} : vector<4x4xf32>, vector<4x256xf32>, vector<4x256xf32> -> vector<4x256xf32>
    %36 = arith.addf %28, %35 : vector<4x256xf32>
    %c15_i32 = arith.constant 15 : i32
    %37 = tpu.dynamic_rotate %21 by %c15_i32 dim 1 : vector<4x256xf32>, i32 -> vector<4x256xf32>
    %c2 = arith.constant 2 : index
    %c0_22 = arith.constant 0 : index
    %38 = vector.load %arg3[%c2, %c0_22] : memref<9x256xf32, #tpu.memory_space<vmem>>, vector<1x256xf32>
    %39 = vector.broadcast %38 : vector<1x256xf32> to vector<4x256xf32>
    %40 = arith.mulf %37, %39 : vector<4x256xf32>
    %c2_23 = arith.constant 2 : index
    %c0_24 = arith.constant 0 : index
    %c0_25 = arith.constant 0 : index
    %41 = vector.load %arg5[%c2_23, %c0_24, %c0_25] : memref<9x4x4xf32, #tpu.memory_space<vmem>>, vector<1x4x4xf32>
    %42 = vector.shape_cast %41 : vector<1x4x4xf32> to vector<4x4xf32>
    %cst_26 = arith.constant dense<0.000000e+00> : vector<4x256xf32>
    %43 = tpu.matmul %42, %40, %cst_26 {dimension_numbers = #tpu.dot_dimension_numbers<[1], [0], [0], [1], [0, 0, 1, 1], [], []>, precision = #tpu.contract_precision<fp32>} : vector<4x4xf32>, vector<4x256xf32>, vector<4x256xf32> -> vector<4x256xf32>
    %44 = arith.addf %36, %43 : vector<4x256xf32>
    %c1_i32 = arith.constant 1 : i32
    %45 = tpu.dynamic_rotate %21 by %c1_i32 dim 1 : vector<4x256xf32>, i32 -> vector<4x256xf32>
    %c3 = arith.constant 3 : index
    %c0_27 = arith.constant 0 : index
    %46 = vector.load %arg3[%c3, %c0_27] : memref<9x256xf32, #tpu.memory_space<vmem>>, vector<1x256xf32>
    %47 = vector.broadcast %46 : vector<1x256xf32> to vector<4x256xf32>
    %48 = arith.mulf %45, %47 : vector<4x256xf32>
    %c3_28 = arith.constant 3 : index
    %c0_29 = arith.constant 0 : index
    %c0_30 = arith.constant 0 : index
    %49 = vector.load %arg5[%c3_28, %c0_29, %c0_30] : memref<9x4x4xf32, #tpu.memory_space<vmem>>, vector<1x4x4xf32>
    %50 = vector.shape_cast %49 : vector<1x4x4xf32> to vector<4x4xf32>
    %cst_31 = arith.constant dense<0.000000e+00> : vector<4x256xf32>
    %51 = tpu.matmul %50, %48, %cst_31 {dimension_numbers = #tpu.dot_dimension_numbers<[1], [0], [0], [1], [0, 0, 1, 1], [], []>, precision = #tpu.contract_precision<fp32>} : vector<4x4xf32>, vector<4x256xf32>, vector<4x256xf32> -> vector<4x256xf32>
    %52 = arith.addf %44, %51 : vector<4x256xf32>
    %c4 = arith.constant 4 : index
    %c0_32 = arith.constant 0 : index
    %c0_33 = arith.constant 0 : index
    %53 = vector.load %arg5[%c4, %c0_32, %c0_33] : memref<9x4x4xf32, #tpu.memory_space<vmem>>, vector<1x4x4xf32>
    %54 = vector.shape_cast %53 : vector<1x4x4xf32> to vector<4x4xf32>
    %cst_34 = arith.constant dense<0.000000e+00> : vector<4x256xf32>
    %55 = tpu.matmul %54, %21, %cst_34 {dimension_numbers = #tpu.dot_dimension_numbers<[1], [0], [0], [1], [0, 0, 1, 1], [], []>, precision = #tpu.contract_precision<fp32>} : vector<4x4xf32>, vector<4x256xf32>, vector<4x256xf32> -> vector<4x256xf32>
    %56 = arith.addf %52, %55 : vector<4x256xf32>
    %c255_i32 = arith.constant 255 : i32
    %57 = tpu.dynamic_rotate %21 by %c255_i32 dim 1 : vector<4x256xf32>, i32 -> vector<4x256xf32>
    %c5 = arith.constant 5 : index
    %c0_35 = arith.constant 0 : index
    %58 = vector.load %arg3[%c5, %c0_35] : memref<9x256xf32, #tpu.memory_space<vmem>>, vector<1x256xf32>
    %59 = vector.broadcast %58 : vector<1x256xf32> to vector<4x256xf32>
    %60 = arith.mulf %57, %59 : vector<4x256xf32>
    %c5_36 = arith.constant 5 : index
    %c0_37 = arith.constant 0 : index
    %c0_38 = arith.constant 0 : index
    %61 = vector.load %arg5[%c5_36, %c0_37, %c0_38] : memref<9x4x4xf32, #tpu.memory_space<vmem>>, vector<1x4x4xf32>
    %62 = vector.shape_cast %61 : vector<1x4x4xf32> to vector<4x4xf32>
    %cst_39 = arith.constant dense<0.000000e+00> : vector<4x256xf32>
    %63 = tpu.matmul %62, %60, %cst_39 {dimension_numbers = #tpu.dot_dimension_numbers<[1], [0], [0], [1], [0, 0, 1, 1], [], []>, precision = #tpu.contract_precision<fp32>} : vector<4x4xf32>, vector<4x256xf32>, vector<4x256xf32> -> vector<4x256xf32>
    %64 = arith.addf %56, %63 : vector<4x256xf32>
    %c241_i32 = arith.constant 241 : i32
    %65 = tpu.dynamic_rotate %21 by %c241_i32 dim 1 : vector<4x256xf32>, i32 -> vector<4x256xf32>
    %c6 = arith.constant 6 : index
    %c0_40 = arith.constant 0 : index
    %66 = vector.load %arg3[%c6, %c0_40] : memref<9x256xf32, #tpu.memory_space<vmem>>, vector<1x256xf32>
    %67 = vector.broadcast %66 : vector<1x256xf32> to vector<4x256xf32>
    %68 = arith.mulf %65, %67 : vector<4x256xf32>
    %c6_41 = arith.constant 6 : index
    %c0_42 = arith.constant 0 : index
    %c0_43 = arith.constant 0 : index
    %69 = vector.load %arg5[%c6_41, %c0_42, %c0_43] : memref<9x4x4xf32, #tpu.memory_space<vmem>>, vector<1x4x4xf32>
    %70 = vector.shape_cast %69 : vector<1x4x4xf32> to vector<4x4xf32>
    %cst_44 = arith.constant dense<0.000000e+00> : vector<4x256xf32>
    %71 = tpu.matmul %70, %68, %cst_44 {dimension_numbers = #tpu.dot_dimension_numbers<[1], [0], [0], [1], [0, 0, 1, 1], [], []>, precision = #tpu.contract_precision<fp32>} : vector<4x4xf32>, vector<4x256xf32>, vector<4x256xf32> -> vector<4x256xf32>
    %72 = arith.addf %64, %71 : vector<4x256xf32>
    %c240_i32 = arith.constant 240 : i32
    %73 = tpu.dynamic_rotate %21 by %c240_i32 dim 1 : vector<4x256xf32>, i32 -> vector<4x256xf32>
    %c7 = arith.constant 7 : index
    %c0_45 = arith.constant 0 : index
    %74 = vector.load %arg3[%c7, %c0_45] : memref<9x256xf32, #tpu.memory_space<vmem>>, vector<1x256xf32>
    %75 = vector.broadcast %74 : vector<1x256xf32> to vector<4x256xf32>
    %76 = arith.mulf %73, %75 : vector<4x256xf32>
    %c7_46 = arith.constant 7 : index
    %c0_47 = arith.constant 0 : index
    %c0_48 = arith.constant 0 : index
    %77 = vector.load %arg5[%c7_46, %c0_47, %c0_48] : memref<9x4x4xf32, #tpu.memory_space<vmem>>, vector<1x4x4xf32>
    %78 = vector.shape_cast %77 : vector<1x4x4xf32> to vector<4x4xf32>
    %cst_49 = arith.constant dense<0.000000e+00> : vector<4x256xf32>
    %79 = tpu.matmul %78, %76, %cst_49 {dimension_numbers = #tpu.dot_dimension_numbers<[1], [0], [0], [1], [0, 0, 1, 1], [], []>, precision = #tpu.contract_precision<fp32>} : vector<4x4xf32>, vector<4x256xf32>, vector<4x256xf32> -> vector<4x256xf32>
    %80 = arith.addf %72, %79 : vector<4x256xf32>
    %c239_i32 = arith.constant 239 : i32
    %81 = tpu.dynamic_rotate %21 by %c239_i32 dim 1 : vector<4x256xf32>, i32 -> vector<4x256xf32>
    %c8 = arith.constant 8 : index
    %c0_50 = arith.constant 0 : index
    %82 = vector.load %arg3[%c8, %c0_50] : memref<9x256xf32, #tpu.memory_space<vmem>>, vector<1x256xf32>
    %83 = vector.broadcast %82 : vector<1x256xf32> to vector<4x256xf32>
    %84 = arith.mulf %81, %83 : vector<4x256xf32>
    %c8_51 = arith.constant 8 : index
    %c0_52 = arith.constant 0 : index
    %c0_53 = arith.constant 0 : index
    %85 = vector.load %arg5[%c8_51, %c0_52, %c0_53] : memref<9x4x4xf32, #tpu.memory_space<vmem>>, vector<1x4x4xf32>
    %86 = vector.shape_cast %85 : vector<1x4x4xf32> to vector<4x4xf32>
    %cst_54 = arith.constant dense<0.000000e+00> : vector<4x256xf32>
    %87 = tpu.matmul %86, %84, %cst_54 {dimension_numbers = #tpu.dot_dimension_numbers<[1], [0], [0], [1], [0, 0, 1, 1], [], []>, precision = #tpu.contract_precision<fp32>} : vector<4x4xf32>, vector<4x256xf32>, vector<4x256xf32> -> vector<4x256xf32>
    %88 = arith.addf %80, %87 : vector<4x256xf32>
    %89 = vector.broadcast %6 : vector<4x1xf32> to vector<4x256xf32>
    %90 = arith.addf %88, %89 : vector<4x256xf32>
    %cst_55 = arith.constant 0.000000e+00 : f32
    %91 = vector.broadcast %cst_55 : f32 to vector<4x256xf32>
    %92 = arith.maximumf %90, %91 : vector<4x256xf32>
    %c0_56 = arith.constant 0 : index
    %c0_57 = arith.constant 0 : index
    %93 = vector.load %arg6[%c0_56, %c0_57] : memref<8x4xf32, #tpu.memory_space<vmem>>, vector<8x4xf32>
    %cst_58 = arith.constant dense<0.000000e+00> : vector<8x256xf32>
    %94 = tpu.matmul %93, %92, %cst_58 {dimension_numbers = #tpu.dot_dimension_numbers<[1], [0], [0], [1], [0, 0, 1, 1], [], []>, precision = #tpu.contract_precision<fp32>} : vector<8x4xf32>, vector<4x256xf32>, vector<8x256xf32> -> vector<8x256xf32>
    %95 = vector.broadcast %7 : vector<8x1xf32> to vector<8x256xf32>
    %96 = arith.addf %94, %95 : vector<8x256xf32>
    %97 = arith.addf %96, %9 : vector<8x256xf32>
    %c0_59 = arith.constant 0 : index
    %c0_60 = arith.constant 0 : index
    %c0_61 = arith.constant 0 : index
    %98 = vector.load %arg8[%c0_59, %c0_60, %c0_61] : memref<1x8x256xf32, #tpu.memory_space<vmem>>, vector<1x8x256xf32>
    %99 = vector.shape_cast %98 : vector<1x8x256xf32> to vector<8x256xf32>
    %100 = vector.shape_cast %97 : vector<8x256xf32> to vector<1x8x256xf32>
    tpu.vector_store %arg8[%c0_59, %c0_60, %c0_61], %100 {strides = array<i32>} : memref<1x8x256xf32, #tpu.memory_space<vmem>>, vector<1x8x256xf32>,
    return
  }
  func.func @transform_0(%arg0: i32) -> (i32, i32, i32) {
    %c0_i32 = arith.constant 0 : i32
    %c0_i32_0 = arith.constant 0 : i32
    %c0_i32_1 = arith.constant 0 : i32
    return %arg0, %c0_i32, %c0_i32_0 : i32, i32, i32
  }
  func.func @transform_1(%arg0: i32) -> (i32, i32) {
    %c0_i32 = arith.constant 0 : i32
    %c0_i32_0 = arith.constant 0 : i32
    %c0_i32_1 = arith.constant 0 : i32
    return %c0_i32, %c0_i32_0 : i32, i32
  }
  func.func @transform_2(%arg0: i32) -> (i32, i32) {
    %c0_i32 = arith.constant 0 : i32
    %c0_i32_0 = arith.constant 0 : i32
    %c0_i32_1 = arith.constant 0 : i32
    return %c0_i32, %c0_i32_0 : i32, i32
  }
  func.func @transform_3(%arg0: i32) -> (i32, i32) {
    %c0_i32 = arith.constant 0 : i32
    %c0_i32_0 = arith.constant 0 : i32
    %c0_i32_1 = arith.constant 0 : i32
    return %c0_i32, %c0_i32_0 : i32, i32
  }
  func.func @transform_4(%arg0: i32) -> (i32, i32, i32) {
    %c0_i32 = arith.constant 0 : i32
    %c0_i32_0 = arith.constant 0 : i32
    %c0_i32_1 = arith.constant 0 : i32
    %c0_i32_2 = arith.constant 0 : i32
    return %c0_i32, %c0_i32_0, %c0_i32_1 : i32, i32, i32
  }
  func.func @transform_5(%arg0: i32) -> (i32, i32) {
    %c0_i32 = arith.constant 0 : i32
    %c0_i32_0 = arith.constant 0 : i32
    %c0_i32_1 = arith.constant 0 : i32
    return %c0_i32, %c0_i32_0 : i32, i32
  }
  func.func @transform_6(%arg0: i32) -> (i32, i32) {
    %c0_i32 = arith.constant 0 : i32
    %c0_i32_0 = arith.constant 0 : i32
    %c0_i32_1 = arith.constant 0 : i32
    return %c0_i32, %c0_i32_0 : i32, i32
  }
  func.func @transform_7(%arg0: i32) -> (i32, i32, i32) {
    %c0_i32 = arith.constant 0 : i32
    %c0_i32_0 = arith.constant 0 : i32
    %c0_i32_1 = arith.constant 0 : i32
    return %arg0, %c0_i32, %c0_i32_0 : i32, i32, i32
  }
}

</mosaic_0001>

<bundles_post_ra>
// kernel: tpu_custom_call.1
= control target key start
LH: loop header
LB: loop body
LE: loop exit
PB: predicated region body
PF: predicated region fallthrough
CT: control target
= control target key end

     0   :  { %12 = vsyncpa [#allocation3], 0  ;;  %s7293_s0 = inlined_call_operand.vmem [shape: f32[2,4,256], index: 0, kind: input, shape index: {}]   ;;  %s7294_s1 = inlined_call_operand.vmem [shape: f32[8,5], index: 1, kind: input, shape index: {}]   ;;  %s7295_s2 = inlined_call_operand.vmem [shape: f32[9,256], index: 2, kind: input, shape index: {}]   ;;  %s7296_s3 = inlined_call_operand.vmem [shape: f32[4,4], index: 3, kind: input, shape index: {}]   ;;  %s7297_s4 = inlined_call_operand.vmem [shape: f32[9,4,4], index: 4, kind: input, shape index: {}]   ;;  %s7298_s5 = inlined_call_operand.vmem [shape: f32[8,4], index: 5, kind: input, shape index: {}]   ;;  %s7299_s6 = inlined_call_operand.vmem [shape: f32[8,4], index: 6, kind: input, shape index: {}]   ;;  %s7300_s7 = inlined_call_operand.hbm [shape: f32[2,8,256], index: 7, kind: output, shape index: {}]  }
   0x1   :  { %14 = vsyncpa [#allocation3 + $0x1], 0  ;;  %s6654_s24 = smov 0   ;;  %s6656_s25 = smov 0  }
   0x2   :  { %s6658_s26 = smov 0   ;;  %s6660_s27 = smov 0  }
   0x3 LB: > { %s6675_s28 = sadd.s32 4294967295, %s6596_s27   ;;  %s6302_s29 = sadd.s32 4294967294, %s6596_s27   ;;  %s6596_s27 = sphi %s6660_s27, %s7306_s27   ;;  %s6592_s26 = sphi %s6658_s26, %s7305_s26   ;;  %s6588_s25 = sphi %s6656_s25, %s7304_s25   ;;  %s6584_s24 = sphi %s6654_s24, %s7303_s24  }
   0x4   : > { %s6679_s30 = sadd.s32 1, %s6596_s27   ;;  %s179_s8 = sadd.s32 1, %s6592_s26 }
   0x5   : > { %s176_s9 = ssub.s32 %s6596_s27, %s6679_s30  ;;  %p189_p0 = scmp.ne.s32.totalorder %s6592_s26, %s6588_s25 }
   0x6   : > { %p177_p1 = scmp.eq.s32.totalorder %s176_s9, 0  ;;  %p190_p2 = scmp.eq.s32.totalorder %s6675_s28, 1 }
   0x7   : > { %p195_p3 = scmp.ne.s32.totalorder %s6588_s25, %s6584_s24  ;;  %p196_p4 = scmp.eq.s32.totalorder %s6302_s29, 1 }
   0x8   : > { %s6690_s10 = scalar_select %p177_p1, %s6592_s26, %s179_s8  }
   0x9   : > { %p6692_p5 = por %p190_p2, %p189_p0  ;;  %p6696_p6 = por %p196_p4, %p195_p3 }
   0xa   : > { %p6305_p7 = scmp.ge.s32.totalorder %s6596_s27, 1  ;;  %p240_p8 = scmp.lt.s32.totalorder %s6596_s27, 3 }
   0xc   : > { %p241_p9 = pnand %p6305_p7, %p240_p8 }
   0xd   : > { %v6705_v0 = vld [vmem:[%s7294_s1] sm:$0xff] (!%p241_p9)  ;;  %p272_p10 = scmp.lt.s32.totalorder (!%p241_p9), %s6675_s28, 1  ;;  %v6598_v1 = vmov (!%p241_p9), 0   ;;  %v6599_v2 = vmov (!%p241_p9), 0.0   ;;  %vm282_vm0 = vcmask (!%p241_p9), 31744   ;;  %vm286_vm1 = vcmask (!%p241_p9), 1043456  }
   0xe   : > { %244 = sbr.rel (%p241_p9) target bundleno = 1227 (0x4cb), region = 48  ;;  %6527 = vset.pattern.permute.xlu0 (!%p241_p9), %v6598_v1  ;;  %357 = vmatprep.mubr.f32.mxu1 (!%p241_p9), %v6599_v2  ;;  %v279_v3 = vld [vmem:[%s7299_s6] sm:$0xff] (!%p241_p9)  ;;  %v6600_v7 = vmov (!%p241_p9), 1   ;;  %v6601_v25 = vmov (!%p241_p9), 2   ;;  %v6602_v26 = vmov (!%p241_p9), 839922192   ;;  %v763_v28 = vlaneseq (!%p241_p9) }
   0xf   : > { %758 = vperm.xlu0 (!%p241_p9), %6527, %v6705_v0   ;;  %v284_v4 = vsel (!%p241_p9), %vm282_vm0, %v279_v3, 0  ;;  %3336 = vmatprep.mubr.f32.mxu0 (!%p241_p9), %v6599_v2  ;;  %v761_v27 = vunpack.c.l.s4 (!%p241_p9), %v6602_v26  ;;  %v782_v29 = vld [vmem:[%s7296_s3] sm:$0xf] (!%p241_p9)  ;;  %v6603_v61 = vmov (!%p241_p9), 4   ;;  %v6315_v62 = vld [vmem:[%s7297_s4 + $0x10] sm:$0xf] (!%p241_p9) }
  0x10   : > { %v358_v5 = vand.u32 (!%p241_p9), 4294901760, %v284_v4  ;;  %6529 = vset.pattern.permute.xlu1 (!%p241_p9), %v6601_v25  ;;  %v6733_v31 = vshrl.u32 (!%p241_p9), %v763_v28, 7  ;;  %v790_v32 = vsel (!%p241_p9), %vm282_vm0, %v782_v29, 0  ;;  %v3262_v63 = vsel (!%p241_p9), %vm282_vm0, %v6315_v62, 0  ;;  %s6604_s9 = smov (!%p241_p9), 127   ;;  %s6605_s13 = smov (!%p241_p9), 16  }
  0x11   : > { %784 = vperm.xlu1 (!%p241_p9), %6529, %v6705_v0   ;;  %v762_v30 = vunpack.c.0.s8 (!%p241_p9), %v761_v27  ;;  %v863_v34 = vand.u32 (!%p241_p9), 4294901760, %v790_v32  ;;  %v6754_v1 = vand.u32 (!%p241_p9), 4294901760, %v3262_v63  ;;  %s6606_s14 = smov (!%p241_p9), 17   ;;  %s6607_s15 = smov (!%p241_p9), 113   ;;  %v6310_v26 = vld [vmem:[%s7297_s4 + $0x4] sm:$0xf] (!%p241_p9) }
  0x12   : > { %v359_v6 = vsub.f32 (!%p241_p9), %v284_v4, %v358_v5  ;;  %s6608_s16 = smov (!%p241_p9), 15   ;;  %s6611_s19 = smov (!%p241_p9), 111   ;;  %v1312_v27 = vsel (!%p241_p9), %vm282_vm0, %v6310_v26, 0  ;;  %v6317_v29 = vld [vmem:[%s7297_s4 + $0x14] sm:$0xf] (!%p241_p9) }
  0x13   : > { %6528 = vset.pattern.permute.xlu0 (!%p241_p9), %v6600_v7  ;;  %v765_v33 = vsub.s32 (!%p241_p9), %v762_v30, %v6733_v31  ;;  %v864_v37 = vsub.f32 (!%p241_p9), %v790_v32, %v863_v34  ;;  %v3338_v3 = vsub.f32 (!%p241_p9), %v3262_v63, %v6754_v1  ;;  %v6776_v30 = vand.u32 (!%p241_p9), 4294901760, %v1312_v27 }
  0x14   : > { %770 = vperm.xlu0 (!%p241_p9), %6528, %v6705_v0   ;;  %v360_v11 = vand.u32 (!%p241_p9), 4294901760, %v359_v6  ;;  %v3762_v32 = vsel (!%p241_p9), %vm282_vm0, %v6317_v29, 0  ;;  %v6311_v29 = vld [vmem:[%s7295_s2 + $0x2] ss:$8 sm:$0x3] (!%p241_p9) }
  0x15   : > { %s273_s17 = scalar_select %p272_p10, %s6675_s28, 1  ;;  %v865_v41 = vand.u32 4294901760, %v864_v37  ;;  %6531 = vset.pattern.permute.xlu1 %v6603_v61 }
  0x16   : > { %v361_v14 = vsub.f32 %v359_v6, %v360_v11 }
  0x17   : > { %s6329_s18 = sshll.u32 %s273_s17, 3  ;;  %v866_v44 = vsub.f32 %v864_v37, %v865_v41  ;;  %s6609_s17 = smov 112  }
  0x18   : > { %s276_s21 = scalar_lea.vmem %s7293_s0, %s6329_s18  ;;  %v362_v17 = vand.u32 4294901760, %v361_v14  ;;  %s6610_s18 = smov 1  }
  0x19   : > { %v277_v8 = vld [vmem:[%s276_s21] sm:$0xff]  ;;  %v867_v51 = vand.u32 4294901760, %v866_v44  ;;  %s6613_s21 = smov [#allocation2]  }
  0x1a   : > { %v281_v9 = vcombine.high %v277_v8, %v277_v8  ;;  %v287_v10 = vsel %vm286_vm1, %v277_v8, 0  ;;  %s6538_s22 = sshll.u32 %s6613_s21, 4  ;;  %s6539_s22 = int_to_ptr.vmem [resolvable:$false] %s6538_s22 }
  0x1b   : > { %v293_v12 = vand.u32 4294901760, %v287_v10  ;;  %s6540_s23 = scalar_lea.vmem %s6539_s22, 512 }
  0x1c   : > { %v289_v13 = vsel %vm286_vm1, %v281_v9, 0 }
  0x1d   : > { %v291_v15 = vand.u32 4294901760, %v289_v13  ;;  %v376_v16 = vsub.f32 %v287_v10, %v293_v12 }
  0x1f   : > { %292 = vmatprep.subr.mxu1 %v291_v15  ;;  %v370_v18 = vsub.f32 %v289_v13, %v291_v15  ;;  %v377_v19 = vand.u32 4294901760, %v376_v16 }
  0x20   : > { %294 = vmatpush1.msra.mxu1 %v293_v12 }
  0x21   : > { %363 = vmatmul.mubr.f32.vlgmr.msra.gmra.mrb[0].mxu1 %v362_v17  ;;  %v371_v20 = vand.u32 4294901760, %v370_v18  ;;  %v378_v21 = vsub.f32 %v376_v16, %v377_v19 }
  0x22   : > { %443 = vmatprep.mubr.f32.mxu1 %v6599_v2 }
  0x23   : > { %v372_v22 = vsub.f32 %v370_v18, %v371_v20  ;;  %v379_v23 = vand.u32 4294901760, %v378_v21 }
  0x25   : > { %v373_v24 = vand.u32 4294901760, %v372_v22 }
  0x27   : > { %374 = vmatprep.subr.mxu1 %v373_v24 }
  0x28   : > { %380 = vmatpush1.msra.mxu1 %v379_v23 }
  0x29   : > { %445 = vmatmul.mubr.f32.vlgmr.msra.gmra.mrb[0].mxu1 %v358_v5  ;;  %453 = vmatprep.subr.mxu1 %v370_v18 }
  0x2a   : > { %456 = vmatpush1.msra.mxu1 %v376_v16  ;;  %519 = vmatprep.mubr.f32.mxu1 %v6599_v2 }
  0x2b   : > { %529 = vmatprep.subr.mxu1 %v291_v15 }
  0x31   : > { %522 = vmatmul.mubr.f32.vlgmr.msra.gmra.mrb[0].mxu1 %v359_v6 }
  0x32   : > { %531 = vmatpush1.msra.mxu1 %v293_v12  ;;  %594 = vmatprep.mubr.f32.mxu1 %v6599_v2 }
  0x33   : > { %607 = vmatprep.subr.mxu1 %v371_v20 }
  0x39   : > { %598 = vmatmul.mubr.f32.vlgmr.msra.gmra.mrb[0].mxu1 %v360_v11 }
  0x3a   : > { %611 = vmatpush1.msra.mxu1 %v377_v19  ;;  %674 = vmatprep.mubr.f32.mxu1 %v6599_v2 }
  0x3b   : > { %683 = vmatprep.subr.mxu1 %v291_v15 }
  0x41   : > { %676 = vmatmul.mubr.f32.vlgmr.msra.gmra.mrb[0].mxu1 %v358_v5 }
  0x42   : > { %685 = vmatpush1.msra.mxu1 %v293_v12  ;;  %748 = vmatprep.mubr.f32.mxu1 %v6599_v2 }
  0x49   : > { %750 = vmatmul.mubr.f32.vlgmr.msra.gmra.mrb[0].mxu1 %v358_v5  ;;  %v3339_v5 = vand.u32 4294901760, %v3338_v3 }
  0x4a   : > { %862 = vmatprep.mubr.f32.mxu1 %v6599_v2 }
  0x4b   : > { %v3340_v11 = vsub.f32 %v3338_v3, %v3339_v5 }
  0x4d   : > { %v3341_v17 = vand.u32 4294901760, %v3340_v11 }
  0x8e   : > { %v759_v35 = vpop.permute.xlu0 %758 }
  0x8f   : > { %v766_v36 = vrot.slane %v759_v35, %v765_v33  ;;  %v6785_v35 = vand.u32 127, %v763_v28 }
  0x90   : > { %v785_v4 = vpop.permute.xlu1 %784 }
  0x91   : > { %v768_v39 = vmul.f32 %v766_v36, %v277_v8  ;;  %v6788_v36 = vsub.s32 0, %v6733_v31  ;;  %vm1291_vm2 = vcmp.lt.s32.totalorder %v6785_v35, 16  ;;  %vm3741_vm3 = vcmp.lt.s32.totalorder %v6785_v35, 127 }
  0x92   : > { %vm1269_vm4 = vcmp.lt.s32.totalorder %v6785_v35, 17  ;;  %vm4241_vm5 = vcmp.lt.s32.totalorder %v6785_v35, 113  ;;  %vm2263_vm6 = vcmp.lt.s32.totalorder %v6785_v35, 15  ;;  %vm4741_vm7 = vcmp.lt.s32.totalorder %v6785_v35, 112 }
  0x93   : > { %v771_v38 = vpop.permute.xlu0 %770  ;;  %vm2763_vm8 = vcmp.lt.s32.totalorder %v6785_v35, 1  ;;  %vm5241_vm9 = vcmp.lt.s32.totalorder %v6785_v35, 111 }
  0x94   : > { %v778_v40 = vrot.slane %v771_v38, %v765_v33  ;;  %v6779_v33 = vand.u32 4294901760, %v3762_v32 }
  0x96   : > { %v780_v42 = vadd.f32 %v778_v40, %v768_v39  ;;  %v6309_v40 = vld [vmem:[%s7295_s2 + $0x1] ss:$8 sm:$0x3] }
  0x97   : > { %v1300_v28 = vrot.slane %v6309_v40, %v6788_v36 }
  0x98   : > { %v781_v43 = vmax.f32 %v780_v42, 0.0 }
  0x9a   : > { %v788_v45 = vcombine.high %v781_v43, %v781_v43  ;;  %v792_v46 = vsel %vm286_vm1, %v781_v43, 0 }
  0x9b   : > { %v798_v47 = vand.u32 4294901760, %v792_v46 }
  0x9c   : > { %v794_v48 = vsel %vm286_vm1, %v788_v45, 0 }
  0x9d   : > { %v881_v49 = vsub.f32 %v792_v46, %v798_v47  ;;  %v796_v50 = vand.u32 4294901760, %v794_v48 }
  0x9f   : > { %797 = vmatprep.subr.mxu1 %v796_v50  ;;  %v875_v52 = vsub.f32 %v794_v48, %v796_v50  ;;  %v882_v53 = vand.u32 4294901760, %v881_v49 }
  0xa0   : > { %799 = vmatpush1.msra.mxu1 %v798_v47 }
  0xa1   : > { %868 = vmatmul.mubr.f32.vlgmr.msra.gmra.mrb[2].mxu1 %v867_v51  ;;  %v876_v54 = vand.u32 4294901760, %v875_v52  ;;  %v883_v55 = vsub.f32 %v881_v49, %v882_v53 }
  0xa2   : > { %948 = vmatprep.mubr.f32.mxu1 %v6599_v2 }
  0xa3   : > { %v877_v56 = vsub.f32 %v875_v52, %v876_v54  ;;  %v884_v58 = vand.u32 4294901760, %v883_v55 }
  0xa5   : > { %v878_v57 = vand.u32 4294901760, %v877_v56 }
  0xa7   : > { %879 = vmatprep.subr.mxu1 %v878_v57 }
  0xa8   : > { %885 = vmatpush1.msra.mxu1 %v884_v58 }
  0xa9   : > { %950 = vmatmul.mubr.f32.vlgmr.msra.gmra.mrb[2].mxu1 %v863_v34  ;;  %958 = vmatprep.subr.mxu1 %v875_v52 }
  0xaa   : > { %961 = vmatpush1.msra.mxu1 %v881_v49  ;;  %1024 = vmatprep.mubr.f32.mxu1 %v6599_v2 }
  0xab   : > { %1034 = vmatprep.subr.mxu1 %v796_v50 }
  0xb1   : > { %1027 = vmatmul.mubr.f32.vlgmr.msra.gmra.mrb[2].mxu1 %v864_v37  ;;  %v6791_v37 = vsub.s32 1, %v6733_v31  ;;  %v6316_v31 = vld [vmem:[%s7295_s2 + $0x5] ss:$8 sm:$0x3] }
  0xb2   : > { %1036 = vmatpush1.msra.mxu1 %v798_v47  ;;  %1099 = vmatprep.mubr.f32.mxu1 %v6599_v2  ;;  %v3750_v52 = vrot.slane %v6316_v31, %v6788_v36 }
  0xb3   : > { %1112 = vmatprep.subr.mxu1 %v876_v54  ;;  %v1304_v43 = vrot.slane %v6309_v40, %v6791_v37  ;;  %v1272_v54 = vld [vmem:[%s7295_s2] ss:$8 sm:$0x3] }
  0xb9   : > { %1103 = vmatmul.mubr.f32.vlgmr.msra.gmra.mrb[2].mxu1 %v865_v41  ;;  %v6797_v41 = vsub.f32 %v3762_v32, %v6779_v33 }
  0xba   : > { %1116 = vmatpush1.msra.mxu1 %v882_v53  ;;  %1179 = vmatprep.mubr.f32.mxu1 %v6599_v2  ;;  %v3754_v53 = vrot.slane %v6316_v31, %v6791_v37  ;;  %v2272_v31 = vrot.slane %v6311_v29, %v6788_v36 }
  0xbb   : > { %1188 = vmatprep.subr.mxu1 %v796_v50  ;;  %v3839_v45 = vand.u32 4294901760, %v6797_v41 }
  0xbd   : > { %v3840_v55 = vsub.f32 %v6797_v41, %v3839_v45 }
  0xc1   : > { %1181 = vmatmul.mubr.f32.vlgmr.msra.gmra.mrb[2].mxu1 %v863_v34 }
  0xc2   : > { %1190 = vmatpush1.msra.mxu1 %v798_v47  ;;  %1253 = vmatprep.mubr.f32.mxu1 %v6599_v2 }
  0xc9   : > { %1255 = vmatmul.mubr.f32.vlgmr.msra.gmra.mrb[2].mxu1 %v863_v34  ;;  %v6782_v34 = vsub.f32 %v1312_v27, %v6776_v30 }
  0xca   : > { %1386 = vmatprep.mubr.f32.mxu1 %v6599_v2 }
  0xcb   : > { %v1389_v42 = vand.u32 4294901760, %v6782_v34 }
  0xcd   : > { %v1390_v47 = vsub.f32 %v6782_v34, %v1389_v42 }
  0xcf   : > { %v1391_v63 = vand.u32 4294901760, %v1390_v47 }
 0x11c   : > { %v6745_v59 = vpop.f32.mrb[0].mxu1 }
 0x11d   : > { %v6747_v60 = vpop.f32.mrb[1].mxu1 }
 0x19c   : > { %v1256_v6 = vpop.f32.mrb[2].mxu1 }
 0x19d   : > { %v6335_v7 = vadd.f32 %v1256_v6, %v785_v4  ;;  %v1258_v8 = vpop.f32.mrb[3].mxu1  ;;  %v6318_v6 = vld [vmem:[%s7295_s2 + $0x6] ss:$8 sm:$0x3] }
 0x19e   : > { %v6336_v9 = vadd.f32 %v1258_v8, %v785_v4 }
 0x19f   : > { %v1261_v10 = vmax.f32 %v6335_v7, 0.0 }
 0x1a0   : > { %v1262_v12 = vmax.f32 %v6336_v9, 0.0  ;;  %v1277_v9 = vrot.slane %v1272_v54, %v6788_v36 }
 0x1a1   : > { %3737 = vrot.lane.b32.xlu0 %v1261_v10, %s6604_s9  ;;  %1287 = vrot.lane.b32.xlu1 %v1261_v10, %s6605_s13  ;;  %v3265_v13 = vsel %vm286_vm1, %v1261_v10, 0 }
 0x1a2   : > { %v3268_v14 = vsel %vm286_vm1, %v1262_v12, 0  ;;  %v3272_v15 = vand.u32 4294901760, %v3265_v13 }
 0x1a3   : > { %v3270_v16 = vand.u32 4294901760, %v3268_v14 }
 0x1a4   : > { %v3355_v18 = vsub.f32 %v3265_v13, %v3272_v15  ;;  %v3841_v13 = vand.u32 4294901760, %v3840_v55 }
 0x1a5   : > { %3271 = vmatprep.subr.mxu0 %v3270_v16  ;;  %1263 = vrot.lane.b32.xlu0 %v1261_v10, %s6606_s14  ;;  %v3349_v19 = vsub.f32 %v3268_v14, %v3270_v16 }
 0x1a6   : > { %1289 = vrot.lane.b32.xlu1 %v1262_v12, %s6605_s13  ;;  %3273 = vmatpush1.msra.mxu0 %v3272_v15  ;;  %v3356_v20 = vand.u32 4294901760, %v3355_v18 }
 0x1a7   : > { %3342 = vmatmul.mubr.f32.vlgmr.msra.gmra.mrb[0].mxu0 %v3341_v17  ;;  %v3350_v21 = vand.u32 4294901760, %v3349_v19  ;;  %v4250_v17 = vrot.slane %v6318_v6, %v6788_v36 }
 0x1a8   : > { %v3357_v22 = vsub.f32 %v3355_v18, %v3356_v20  ;;  %3422 = vmatprep.mubr.f32.mxu0 %v6599_v2 }
 0x1a9   : > { %4237 = vrot.lane.b32.xlu0 %v1261_v10, %s6607_s15  ;;  %v3351_v23 = vsub.f32 %v3349_v19, %v3350_v21 }
 0x1aa   : > { %3739 = vrot.lane.b32.xlu1 %v1262_v12, %s6604_s9  ;;  %v3358_v25 = vand.u32 4294901760, %v3357_v22  ;;  %s269_s9 = sand.u32 1, %s6588_s25  }
 0x1ab   : > { %v3352_v24 = vand.u32 4294901760, %v3351_v23  ;;  %s6306_s13 = sshll.u32 %s269_s9, 4 }
 0x1ad   : > { %2259 = vrot.lane.b32.xlu0 %v1261_v10, %s6608_s16  ;;  %3353 = vmatprep.subr.mxu0 %v3352_v24 }
 0x1ae   : > { %1265 = vrot.lane.b32.xlu1 %v1262_v12, %s6606_s14  ;;  %3359 = vmatpush1.msra.mxu0 %v3358_v25  ;;  %s6330_s14 = sshll.u32 %s6675_s28, 8  ;;  %s6229_s28 = scalar_lea.sflag [#allocation3], %s269_s9 }
 0x1af   : > { %3424 = vmatmul.mubr.f32.vlgmr.msra.gmra.mrb[0].mxu0 %v6754_v1  ;;  %3432 = vmatprep.subr.mxu0 %v3349_v19 }
 0x1b0   : > { %3435 = vmatpush1.msra.mxu0 %v3355_v18  ;;  %3498 = vmatprep.mubr.f32.mxu0 %v6599_v2  ;;  %v4254_v18 = vrot.slane %v6318_v6, %v6791_v37  ;;  %v6313_v6 = vld [vmem:[%s7295_s2 + $0x3] ss:$8 sm:$0x3] }
 0x1b1   : > { %4737 = vrot.lane.b32.xlu0 %v1261_v10, %s6609_s17  ;;  %3508 = vmatprep.subr.mxu0 %v3270_v16 }
 0x1b2   : > { %4239 = vrot.lane.b32.xlu1 %v1262_v12, %s6607_s15  ;;  %s271_s15 = scalar_lea.vmem [#allocation2], %s6306_s13 }
 0x1b5   : > { %2759 = vrot.lane.b32.xlu0 %v1261_v10, %s6610_s18 }
 0x1b6   : > { %2261 = vrot.lane.b32.xlu1 %v1262_v12, %s6608_s16  ;;  %s6243_s16 = sshll.u32 %s271_s15, 4  ;;  %s7253_s16 = int_to_ptr.vmem [resolvable:$true] %s6243_s16 }
 0x1b7   : > { %3501 = vmatmul.mubr.f32.vlgmr.msra.gmra.mrb[0].mxu0 %v3338_v3  ;;  %s6534_s20 = scalar_lea.vmem %s7253_s16, 256  ;;  %p6541_p0 = scmp.lt.s32.totalorder %s7253_s16, %s6539_s22 }
 0x1b8   : > { %3510 = vmatpush1.msra.mxu0 %v3272_v15  ;;  %3573 = vmatprep.mubr.f32.mxu0 %v6599_v2  ;;  %p6535_p11 = scmp.ne.s32.totalorder %s7253_s16, %s6534_s20  ;;  %p6542_p1 = scmp.lt.s32.totalorder %s6540_s23, %s6534_s20 }
 0x1b9   : > { %3586 = vmatprep.subr.mxu0 %v3350_v21  ;;  %5237 = vrot.lane.b32.xlu0 %v1261_v10, %s6611_s19  ;;  %v1281_v10 = vrot.slane %v1272_v54, %v6791_v37 }
 0x1ba   : > { %4739 = vrot.lane.b32.xlu1 %v1262_v12, %s6609_s17  ;;  %p6536_p12 = pnand %p6535_p11, %p6692_p5  ;;  %p6543_p2 = por %p6542_p1, %p6541_p0 }
 0x1bc   : > { %p6537_p13 = pneg %p6536_p12 }
 0x1be   : > { %2761 = vrot.lane.b32.xlu1 %v1262_v12, %s6610_s18  ;;  %p6544_p3 = pnand %p6543_p2, %p6537_p13 }
 0x1bf   : > { %3577 = vmatmul.mubr.f32.vlgmr.msra.gmra.mrb[0].mxu0 %v3339_v5 }
 0x1c0   : > { %3590 = vmatpush1.msra.mxu0 %v3356_v20  ;;  %3653 = vmatprep.mubr.f32.mxu0 %v6599_v2 }
 0x1c1   : > { %3662 = vmatprep.subr.mxu0 %v3270_v16 }
 0x1c2   : > { %5239 = vrot.lane.b32.xlu1 %v1262_v12, %s6611_s19  ;;  %s7251_s19 = scalar_lea.hbm %s7300_s7, %s6330_s14 }
 0x1c6   : > { %5747 = vperm.xlu1 %6531, %v6705_v0  }
 0x1c7   : > { %3655 = vmatmul.mubr.f32.vlgmr.msra.gmra.mrb[0].mxu0 %v6754_v1 }
 0x1c8   : > { %3664 = vmatpush1.msra.mxu0 %v3272_v15  ;;  %3727 = vmatprep.mubr.f32.mxu0 %v6599_v2 }
 0x1cf   : > { %3729 = vmatmul.mubr.f32.vlgmr.msra.gmra.mrb[0].mxu0 %v6754_v1 }
 0x1d0   : > { %3836 = vmatprep.mubr.f32.mxu0 %v6599_v2 }
 0x213   : > { %v3738_v38 = vpop.permute.xlu0 %3737  ;;  %v1288_v39 = vpop.permute.xlu1 %1287 }
 0x217   : > { %v1264_v44 = vpop.permute.xlu0 %1263 }
 0x218   : > { %v1290_v46 = vpop.permute.xlu1 %1289 }
 0x219   : > { %v1292_v48 = vsel %vm1291_vm2, %v1288_v39, %v1290_v46  ;;  %v1293_v49 = vsel %vm1291_vm2, %v1290_v46, %v1288_v39  ;;  %v2276_v46 = vrot.slane %v6311_v29, %v6791_v37 }
 0x21a   : > { %v1307_v50 = vmul.f32 %v1300_v28, %v1293_v49  ;;  %v1308_v51 = vmul.f32 %v1304_v43, %v1292_v48 }
 0x21b   : > { %v4238_v58 = vpop.permute.xlu0 %4237 }
 0x21c   : > { %v1315_v56 = vsel %vm286_vm1, %v1307_v50, 0  ;;  %v1318_v57 = vsel %vm286_vm1, %v1308_v51, 0  ;;  %v3740_v62 = vpop.permute.xlu1 %3739  ;;  %v6320_v51 = vld [vmem:[%s7295_s2 + $0x7] ss:$8 sm:$0x3] }
 0x21d   : > { %v6822_v1 = vand.u32 4294901760, %v1318_v57  ;;  %v6824_v3 = vand.u32 4294901760, %v1315_v56  ;;  %v3742_v4 = vsel %vm3741_vm3, %v3738_v38, %v3740_v62  ;;  %v3743_v5 = vsel %vm3741_vm3, %v3740_v62, %v3738_v38 }
 0x21e   : > { %v3757_v7 = vmul.f32 %v3750_v52, %v3742_v4  ;;  %v3758_v8 = vmul.f32 %v3754_v53, %v3743_v5  ;;  %v4754_v62 = vrot.slane %v6320_v51, %v6791_v37 }
 0x21f   : > { %v6836_v11 = vsub.f32 %v1318_v57, %v6822_v1  ;;  %v6839_v12 = vsub.f32 %v1315_v56, %v6824_v3  ;;  %1321 = vmatprep.subr.mxu1 %v6822_v1  ;;  %v2260_v23 = vpop.permute.xlu0 %2259 }
 0x220   : > { %v3765_v14 = vsel %vm286_vm1, %v3757_v7, 0  ;;  %v3768_v15 = vsel %vm286_vm1, %v3758_v8, 0  ;;  %1323 = vmatpush1.msra.mxu1 %v6824_v3  ;;  %v1266_v16 = vpop.permute.xlu1 %1265 }
 0x221   : > { %v6848_v19 = vand.u32 4294901760, %v3768_v15  ;;  %v6850_v20 = vand.u32 4294901760, %v3765_v14  ;;  %v1270_v21 = vsel %vm1269_vm4, %v1264_v44, %v1266_v16  ;;  %v1271_v22 = vsel %vm1269_vm4, %v1266_v16, %v1264_v44  ;;  %1392 = vmatmul.mubr.f32.vlgmr.msra.gmra.mrb[4].mxu1 %v1391_v63 }
 0x222   : > { %v6856_v24 = vmul.f32 %v1277_v9, %v1271_v22  ;;  %v6858_v25 = vmul.f32 %v1281_v10, %v1270_v21  ;;  %v1400_v26 = vand.u32 4294901760, %v6836_v11  ;;  %v1406_v27 = vand.u32 4294901760, %v6839_v12  ;;  %1472 = vmatprep.mubr.f32.mxu1 %v6599_v2  ;;  %v6322_v22 = vld [vmem:[%s7295_s2 + $0x10] ss:$8 sm:$0x3] }
 0x223   : > { %v6867_v32 = vsub.f32 %v3768_v15, %v6848_v19  ;;  %v6870_v38 = vsub.f32 %v3765_v14, %v6850_v20  ;;  %3771 = vmatprep.subr.mxu0 %v6848_v19  ;;  %v4738_v54 = vpop.permute.xlu0 %4737  ;;  %v2772_v14 = vrot.slane %v6313_v6, %v6788_v36  ;;  %v2776_v21 = vrot.slane %v6313_v6, %v6791_v37 }
 0x224   : > { %v4240_v39 = vpop.permute.xlu1 %4239  ;;  %3773 = vmatpush1.msra.mxu0 %v6850_v20  ;;  %v1401_v40 = vsub.f32 %v6836_v11, %v1400_v26  ;;  %v1407_v28 = vsub.f32 %v6839_v12, %v1406_v27 }
 0x225   : > { %v4242_v43 = vsel %vm4241_vm5, %v4238_v58, %v4240_v39  ;;  %v4243_v44 = vsel %vm4241_vm5, %v4240_v39, %v4238_v58  ;;  %3842 = vmatmul.mubr.f32.vlgmr.msra.gmra.mrb[0].mxu0 %v3841_v13  ;;  %v3850_v52 = vand.u32 4294901760, %v6867_v32  ;;  %v3856_v53 = vand.u32 4294901760, %v6870_v38 }
 0x226   : > { %v6887_v47 = vmul.f32 %v4250_v17, %v4242_v43  ;;  %v6889_v48 = vmul.f32 %v4254_v18, %v4243_v44  ;;  %v1402_v49 = vand.u32 4294901760, %v1401_v40  ;;  %v1408_v50 = vand.u32 4294901760, %v1407_v28  ;;  %3922 = vmatprep.mubr.f32.mxu0 %v6599_v2 }
 0x227   : > { %v4750_v58 = vrot.slane %v6320_v51, %v6788_v36  ;;  %v3851_v5 = vsub.f32 %v6867_v32, %v3850_v52  ;;  %v3857_v7 = vsub.f32 %v6870_v38, %v3856_v53  ;;  %v2760_v15 = vpop.permute.xlu0 %2759  ;;  %v5250_v40 = vrot.slane %v6322_v22, %v6788_v36  ;;  %v1286_v51 = vld [vmem:[%s7297_s4] sm:$0xf] }
 0x228   : > { %1403 = vmatprep.subr.mxu1 %v1402_v49  ;;  %v2262_v55 = vpop.permute.xlu1 %2261  ;;  %v5254_v44 = vrot.slane %v6322_v22, %v6791_v37  ;;  %v1792_v37 = vsel %vm286_vm1, %v6858_v25, 0  ;;  %v1786_v25 = vsel %vm282_vm0, %v1286_v51, 0 }
 0x229   : > { %1409 = vmatpush1.msra.mxu1 %v1408_v50  ;;  %v2264_v56 = vsel %vm2263_vm6, %v2260_v23, %v2262_v55  ;;  %v2265_v57 = vsel %vm2263_vm6, %v2262_v55, %v2260_v23  ;;  %v3852_v8 = vand.u32 4294901760, %v3851_v5  ;;  %v3858_v18 = vand.u32 4294901760, %v3857_v7 }
 0x22a   : > { %v6903_v63 = vmul.f32 %v2272_v31, %v2265_v57  ;;  %v6905_v4 = vmul.f32 %v2276_v46, %v2264_v56  ;;  %1474 = vmatmul.mubr.f32.vlgmr.msra.gmra.mrb[4].mxu1 %v6776_v30  ;;  %1482 = vmatprep.subr.mxu1 %v6836_v11  ;;  %v6959_v11 = vand.u32 4294901760, %v1792_v37 }
 0x22b   : > { %1485 = vmatpush1.msra.mxu1 %v6839_v12  ;;  %1548 = vmatprep.mubr.f32.mxu1 %v6599_v2  ;;  %v5238_v31 = vpop.permute.xlu0 %5237  ;;  %v6319_v12 = vld [vmem:[%s7297_s4 + $0x18] sm:$0xf] }
 0x22c   : > { %1558 = vmatprep.subr.mxu1 %v6822_v1  ;;  %v4740_v9 = vpop.permute.xlu1 %4739  ;;  %3853 = vmatprep.subr.mxu0 %v3852_v8 }
 0x22d   : > { %v4742_v10 = vsel %vm4741_vm7, %v4738_v54, %v4740_v9  ;;  %v4743_v13 = vsel %vm4741_vm7, %v4740_v9, %v4738_v54  ;;  %3859 = vmatpush1.msra.mxu0 %v3858_v18  ;;  %v2290_v18 = vsel %vm286_vm1, %v6905_v4, 0 }
 0x22e   : > { %v6924_v16 = vmul.f32 %v4750_v58, %v4742_v10  ;;  %v6926_v17 = vmul.f32 %v4754_v62, %v4743_v13  ;;  %3924 = vmatmul.mubr.f32.vlgmr.msra.gmra.mrb[0].mxu0 %v6779_v33  ;;  %3932 = vmatprep.subr.mxu0 %v6867_v32  ;;  %v6979_v32 = vand.u32 4294901760, %v1786_v25  ;;  %v7064_v22 = vand.u32 4294901760, %v2290_v18 }
 0x22f   : > { %3935 = vmatpush1.msra.mxu0 %v6870_v38  ;;  %3998 = vmatprep.mubr.f32.mxu0 %v6599_v2 }
 0x230   : > { %v2762_v23 = vpop.permute.xlu1 %2761  ;;  %4008 = vmatprep.subr.mxu0 %v6848_v19  ;;  %v7075_v4 = vsub.f32 %v2290_v18, %v7064_v22 }
 0x231   : > { %v2764_v29 = vsel %vm2763_vm8, %v2760_v15, %v2762_v23  ;;  %v2765_v39 = vsel %vm2763_vm8, %v2762_v23, %v2760_v15 }
 0x232   : > { %v6936_v28 = vmul.f32 %v2772_v14, %v2765_v39  ;;  %v6938_v43 = vmul.f32 %v2776_v21, %v2764_v29  ;;  %1551 = vmatmul.mubr.f32.vlgmr.msra.gmra.mrb[4].mxu1 %v6782_v34  ;;  %v6975_v34 = vsub.f32 %v1792_v37, %v6959_v11  ;;  %v6312_v21 = vld [vmem:[%s7297_s4 + $0x8] sm:$0xf]  ;;  %v4768_v29 = vsel %vm286_vm1, %v6926_v17, 0 }
 0x233   : > { %1560 = vmatpush1.msra.mxu1 %v6824_v3  ;;  %1623 = vmatprep.mubr.f32.mxu1 %v6599_v2  ;;  %v2284_v23 = vsel %vm282_vm0, %v6312_v21, 0 }
 0x234   : > { %1636 = vmatprep.subr.mxu1 %v1400_v26  ;;  %v5240_v36 = vpop.permute.xlu1 %5239  ;;  %v1789_v26 = vsel %vm286_vm1, %v6856_v24, 0  ;;  %v1874_v24 = vand.u32 4294901760, %v6975_v34  ;;  %v7079_v39 = vand.u32 4294901760, %v2284_v23 }
 0x235   : > { %v5242_v46 = vsel %vm5241_vm9, %v5238_v31, %v5240_v36  ;;  %v5243_v49 = vsel %vm5241_vm9, %v5240_v36, %v5238_v31  ;;  %v7086_v31 = vand.u32 4294901760, %v4768_v29 }
 0x236   : > { %v6949_v50 = vmul.f32 %v5250_v40, %v5242_v46  ;;  %v6951_v35 = vmul.f32 %v5254_v44, %v5243_v49  ;;  %4001 = vmatmul.mubr.f32.vlgmr.msra.gmra.mrb[0].mxu0 %v6797_v41  ;;  %v6321_v40 = vld [vmem:[%s7297_s4 + $0x1c] sm:$0xf]  ;;  %v4765_v46 = vsel %vm286_vm1, %v6924_v16, 0 }
 0x237   : > { %4010 = vmatpush1.msra.mxu0 %v6850_v20  ;;  %4073 = vmatprep.mubr.f32.mxu0 %v6599_v2  ;;  %v4762_v17 = vsel %vm282_vm0, %v6321_v40, 0  ;;  %v4849_v49 = vsub.f32 %v4768_v29, %v7086_v31 }
 0x238   : > { %4086 = vmatprep.subr.mxu0 %v3850_v52  ;;  %v4262_v52 = vsel %vm282_vm0, %v6319_v12, 0  ;;  %v7105_v37 = vand.u32 4294901760, %v4762_v17 }
 0x23a   : > { %1627 = vmatmul.mubr.f32.vlgmr.msra.gmra.mrb[4].mxu1 %v1389_v42  ;;  %v4268_v42 = vsel %vm286_vm1, %v6889_v48, 0  ;;  %v6995_v48 = vsub.f32 %v1786_v25, %v6979_v32  ;;  %v7109_v25 = vand.u32 4294901760, %v4765_v46 }
 0x23b   : > { %1640 = vmatpush1.msra.mxu1 %v1406_v27  ;;  %1703 = vmatprep.mubr.f32.mxu1 %v6599_v2  ;;  %v6986_v27 = vand.u32 4294901760, %v4268_v42 }
 0x23c   : > { %1712 = vmatprep.subr.mxu1 %v6822_v1  ;;  %v6984_v1 = vand.u32 4294901760, %v1789_v26 }
 0x23d   : > { %v7008_v38 = vsub.f32 %v4268_v42, %v6986_v27  ;;  %v7114_v42 = vsub.f32 %v4762_v17, %v7105_v37 }
 0x23e   : > { %4077 = vmatmul.mubr.f32.vlgmr.msra.gmra.mrb[0].mxu0 %v3839_v45  ;;  %v7003_v41 = vsub.f32 %v1789_v26, %v6984_v1  ;;  %v4265_v45 = vsel %vm286_vm1, %v6887_v47, 0  ;;  %v4850_v26 = vand.u32 4294901760, %v4849_v49 }
 0x23f   : > { %4090 = vmatpush1.msra.mxu0 %v3856_v53  ;;  %4153 = vmatprep.mubr.f32.mxu0 %v6599_v2  ;;  %v7011_v53 = vand.u32 4294901760, %v4262_v52  ;;  %v7015_v54 = vand.u32 4294901760, %v4265_v45  ;;  %v4350_v55 = vand.u32 4294901760, %v7008_v38 }
 0x240   : > { %4162 = vmatprep.subr.mxu0 %v6848_v19  ;;  %v1875_v19 = vsub.f32 %v6975_v34, %v1874_v24  ;;  %v1880_v56 = vand.u32 4294901760, %v7003_v41 }
 0x241   : > { %v7021_v47 = vsub.f32 %v4262_v52, %v7011_v53  ;;  %v7029_v62 = vsub.f32 %v4265_v45, %v7015_v54  ;;  %v4351_v5 = vsub.f32 %v7008_v38, %v4350_v55 }
 0x242   : > { %1705 = vmatmul.mubr.f32.vlgmr.msra.gmra.mrb[4].mxu1 %v6776_v30  ;;  %v1876_v57 = vand.u32 4294901760, %v1875_v19 }
 0x243   : > { %1714 = vmatpush1.msra.mxu1 %v6824_v3  ;;  %1777 = vmatprep.mubr.f32.mxu1 %v6599_v2  ;;  %v1863_v3 = vand.u32 4294901760, %v6995_v48  ;;  %v4356_v7 = vand.u32 4294901760, %v7029_v62  ;;  %v4352_v8 = vand.u32 4294901760, %v4351_v5  ;;  %v6323_v5 = vld [vmem:[%s7297_s4 + $0x20] sm:$0xf] }
 0x244   : > { %1795 = vmatprep.subr.mxu1 %v6959_v11 }
 0x245   : > { %v1864_v58 = vsub.f32 %v6995_v48, %v1863_v3  ;;  %v4357_v13 = vsub.f32 %v7029_v62, %v4356_v7 }
 0x246   : > { %4155 = vmatmul.mubr.f32.vlgmr.msra.gmra.mrb[0].mxu0 %v6779_v33 }
 0x247   : > { %4164 = vmatpush1.msra.mxu0 %v6850_v20  ;;  %4227 = vmatprep.mubr.f32.mxu0 %v6599_v2  ;;  %v1881_v20 = vsub.f32 %v7003_v41, %v1880_v56  ;;  %v1865_v6 = vand.u32 4294901760, %v1864_v58  ;;  %v4358_v15 = vand.u32 4294901760, %v4357_v13  ;;  %v5268_v58 = vsel %vm286_vm1, %v6951_v35, 0 }
 0x248   : > { %4271 = vmatprep.subr.mxu0 %v6986_v27  ;;  %v5262_v35 = vsel %vm282_vm0, %v6323_v5, 0 }
 0x249   : > { %v1882_v9 = vand.u32 4294901760, %v1881_v20 }
 0x24a   : > { %1779 = vmatmul.mubr.f32.vlgmr.msra.gmra.mrb[4].mxu1 %v6776_v30  ;;  %v4339_v30 = vand.u32 4294901760, %v7021_v47 }
 0x24b   : > { %1797 = vmatpush1.msra.mxu1 %v6984_v1  ;;  %1860 = vmatprep.mubr.f32.mxu1 %v6599_v2 }
 0x24c   : > { %1877 = vmatprep.subr.mxu1 %v1876_v57  ;;  %v4340_v10 = vsub.f32 %v7021_v47, %v4339_v30 }
 0x24e   : > { %4229 = vmatmul.mubr.f32.vlgmr.msra.gmra.mrb[0].mxu0 %v6779_v33  ;;  %v4341_v14 = vand.u32 4294901760, %v4340_v10  ;;  %v6612_v33 = vmov 3   ;;  %v7187_v10 = vand.u32 4294901760, %v5262_v35 }
 0x24f   : > { %4273 = vmatpush1.msra.mxu0 %v7015_v54  ;;  %4336 = vmatprep.mubr.f32.mxu0 %v6599_v2 }
 0x250   : > { %4353 = vmatprep.subr.mxu0 %v4352_v8  ;;  %6530 = vset.pattern.permute.xlu0 %v6612_v33  ;;  %v5265_v8 = vsel %vm286_vm1, %v6949_v50, 0  ;;  %v5338_v21 = vsub.f32 %v5262_v35, %v7187_v10 }
 0x251   : > { %5738 = vperm.xlu0 %6530, %v6705_v0   ;;  %v2287_v0 = vsel %vm286_vm1, %v6903_v63, 0  ;;  %v7091_v63 = vsub.f32 %v2284_v23, %v7079_v39 }
 0x252   : > { %1866 = vmatmul.mubr.f32.vlgmr.msra.gmra.mrb[4].mxu1 %v1865_v6  ;;  %v7084_v44 = vand.u32 4294901760, %v2287_v0  ;;  %v5339_v29 = vand.u32 4294901760, %v5338_v21 }
 0x253   : > { %1883 = vmatpush1.msra.mxu1 %v1882_v9  ;;  %1946 = vmatprep.mubr.f32.mxu1 %v6599_v2 }
 0x254   : > { %1956 = vmatprep.subr.mxu1 %v6975_v34  ;;  %v7099_v36 = vsub.f32 %v2287_v0, %v7084_v44 }
 0x255   : > { %6532 = vset.pattern.permute.xlu0 %v6603_v61  ;;  %v2372_v61 = vand.u32 4294901760, %v7075_v4 }
 0x256   : > { %4342 = vmatmul.mubr.f32.vlgmr.msra.gmra.mrb[0].mxu0 %v4341_v14  ;;  %v2378_v34 = vand.u32 4294901760, %v7099_v36 }
 0x257   : > { %4359 = vmatpush1.msra.mxu0 %v4358_v15  ;;  %4422 = vmatprep.mubr.f32.mxu0 %v6599_v2  ;;  %v2373_v51 = vsub.f32 %v7075_v4, %v2372_v61  ;;  %v7191_v15 = vand.u32 4294901760, %v5265_v8 }
 0x258   : > { %4432 = vmatprep.subr.mxu0 %v7008_v38 }
 0x259   : > { %v2374_v16 = vand.u32 4294901760, %v2373_v51  ;;  %v5355_v23 = vsub.f32 %v5265_v8, %v7191_v15 }
 0x25a   : > { %1948 = vmatmul.mubr.f32.vlgmr.msra.gmra.mrb[4].mxu1 %v6979_v32 }
 0x25b   : > { %1959 = vmatpush1.msra.mxu1 %v7003_v41  ;;  %2022 = vmatprep.mubr.f32.mxu1 %v6599_v2 }
 0x25c   : > { %2032 = vmatprep.subr.mxu1 %v6959_v11 }
 0x25e   : > { %4424 = vmatmul.mubr.f32.vlgmr.msra.gmra.mrb[0].mxu0 %v7011_v53 }
 0x25f   : > { %4435 = vmatpush1.msra.mxu0 %v7029_v62  ;;  %4498 = vmatprep.mubr.f32.mxu0 %v6599_v2 }
 0x260   : > { %4508 = vmatprep.subr.mxu0 %v6986_v27 }
 0x262   : > { %2025 = vmatmul.mubr.f32.vlgmr.msra.gmra.mrb[4].mxu1 %v6995_v48  ;;  %v4839_v48 = vand.u32 4294901760, %v7114_v42 }
 0x263   : > { %2034 = vmatpush1.msra.mxu1 %v6984_v1  ;;  %2097 = vmatprep.mubr.f32.mxu1 %v6599_v2 }
 0x264   : > { %2110 = vmatprep.subr.mxu1 %v1874_v24  ;;  %v2379_v24 = vsub.f32 %v7099_v36, %v2378_v34  ;;  %v4840_v38 = vsub.f32 %v7114_v42, %v4839_v48 }
 0x266   : > { %4501 = vmatmul.mubr.f32.vlgmr.msra.gmra.mrb[0].mxu0 %v7021_v47  ;;  %v2380_v45 = vand.u32 4294901760, %v2379_v24 }
 0x267   : > { %4510 = vmatpush1.msra.mxu0 %v7015_v54  ;;  %4573 = vmatprep.mubr.f32.mxu0 %v6599_v2 }
 0x268   : > { %4586 = vmatprep.subr.mxu0 %v4350_v55  ;;  %v6314_v55 = vld [vmem:[%s7297_s4 + $0xc] sm:$0xf] }
 0x269   : > { %v2784_v47 = vsel %vm282_vm0, %v6314_v55, 0 }
 0x26a   : > { %2101 = vmatmul.mubr.f32.vlgmr.msra.gmra.mrb[4].mxu1 %v1863_v3  ;;  %v4841_v3 = vand.u32 4294901760, %v4840_v38  ;;  %v7163_v62 = vand.u32 4294901760, %v2784_v47 }
 0x26b   : > { %2114 = vmatpush1.msra.mxu1 %v1880_v56  ;;  %2177 = vmatprep.mubr.f32.mxu1 %v6599_v2 }
 0x26c   : > { %2186 = vmatprep.subr.mxu1 %v6959_v11  ;;  %v2361_v11 = vand.u32 4294901760, %v7091_v63  ;;  %v7175_v6 = vsub.f32 %v2784_v47, %v7163_v62 }
 0x26e   : > { %4577 = vmatmul.mubr.f32.vlgmr.msra.gmra.mrb[0].mxu0 %v4339_v30  ;;  %v2362_v12 = vsub.f32 %v7091_v63, %v2361_v11  ;;  %v7170_v30 = vand.u32 4294901760, %v5268_v58  ;;  %v2861_v14 = vand.u32 4294901760, %v7175_v6 }
 0x26f   : > { %4590 = vmatpush1.msra.mxu0 %v4356_v7  ;;  %4653 = vmatprep.mubr.f32.mxu0 %v6599_v2 }
 0x270   : > { %4662 = vmatprep.subr.mxu0 %v6986_v27  ;;  %v4851_v27 = vsub.f32 %v4849_v49, %v4850_v26  ;;  %v5349_v9 = vsub.f32 %v5268_v58, %v7170_v30 }
 0x272   : > { %2179 = vmatmul.mubr.f32.vlgmr.msra.gmra.mrb[4].mxu1 %v6979_v32  ;;  %v4852_v41 = vand.u32 4294901760, %v4851_v27  ;;  %v5350_v33 = vand.u32 4294901760, %v5349_v9 }
 0x273   : > { %2188 = vmatpush1.msra.mxu1 %v6984_v1  ;;  %2251 = vmatprep.mubr.f32.mxu1 %v6599_v2  ;;  %v4855_v1 = vsub.f32 %v4765_v46, %v7109_v25  ;;  %v5745_v46 = vld [vmem:[%s7298_s5] sm:$0xff] }
 0x274   : > { %2293 = vmatprep.subr.mxu1 %v7064_v22  ;;  %v5351_v0 = vsub.f32 %v5349_v9, %v5350_v33 }
 0x275   : > { %v4856_v52 = vand.u32 4294901760, %v4855_v1 }
 0x276   : > { %4655 = vmatmul.mubr.f32.vlgmr.msra.gmra.mrb[0].mxu0 %v7011_v53 }
 0x277   : > { %4664 = vmatpush1.msra.mxu0 %v7015_v54  ;;  %4727 = vmatprep.mubr.f32.mxu0 %v6599_v2  ;;  %v4857_v19 = vsub.f32 %v4855_v1, %v4856_v52 }
 0x278   : > { %4771 = vmatprep.subr.mxu0 %v7086_v31 }
 0x279   : > { %v4858_v54 = vand.u32 4294901760, %v4857_v19 }
 0x27a   : > { %2253 = vmatmul.mubr.f32.vlgmr.msra.gmra.mrb[4].mxu1 %v6979_v32  ;;  %v2363_v32 = vand.u32 4294901760, %v2362_v12 }
 0x27b   : > { %2295 = vmatpush1.msra.mxu1 %v7084_v44  ;;  %2358 = vmatprep.mubr.f32.mxu1 %v6599_v2 }
 0x27c   : > { %2375 = vmatprep.subr.mxu1 %v2374_v16 }
 0x27e   : > { %4729 = vmatmul.mubr.f32.vlgmr.msra.gmra.mrb[0].mxu0 %v7011_v53  ;;  %v2790_v53 = vsel %vm286_vm1, %v6938_v43, 0  ;;  %v2787_v43 = vsel %vm286_vm1, %v6936_v28, 0 }
 0x27f   : > { %4773 = vmatpush1.msra.mxu0 %v7109_v25  ;;  %4836 = vmatprep.mubr.f32.mxu0 %v6599_v2  ;;  %v7149_v56 = vand.u32 4294901760, %v2790_v53  ;;  %v7168_v20 = vand.u32 4294901760, %v2787_v43 }
 0x280   : > { %4853 = vmatprep.subr.mxu0 %v4852_v41 }
 0x281   : > { %v7159_v57 = vsub.f32 %v2790_v53, %v7149_v56  ;;  %v2877_v7 = vsub.f32 %v2787_v43, %v7168_v20 }
 0x282   : > { %2364 = vmatmul.mubr.f32.vlgmr.msra.gmra.mrb[4].mxu1 %v2363_v32 }
 0x283   : > { %2381 = vmatpush1.msra.mxu1 %v2380_v45  ;;  %2444 = vmatprep.mubr.f32.mxu1 %v6599_v2  ;;  %v2872_v28 = vand.u32 4294901760, %v7159_v57  ;;  %v2878_v18 = vand.u32 4294901760, %v2877_v7 }
 0x284   : > { %2454 = vmatprep.subr.mxu1 %v7075_v4 }
 0x285   : > { %v2873_v13 = vsub.f32 %v7159_v57, %v2872_v28  ;;  %v2879_v4 = vsub.f32 %v2877_v7, %v2878_v18 }
 0x286   : > { %4842 = vmatmul.mubr.f32.vlgmr.msra.gmra.mrb[0].mxu0 %v4841_v3 }
 0x287   : > { %4859 = vmatpush1.msra.mxu0 %v4858_v54  ;;  %4922 = vmatprep.mubr.f32.mxu0 %v6599_v2  ;;  %v2874_v50 = vand.u32 4294901760, %v2873_v13 }
 0x288   : > { %4932 = vmatprep.subr.mxu0 %v4849_v49  ;;  %v5751_v49 = vsel %vm282_vm0, %v5745_v46, 0 }
 0x289   : > { %v5826_v51 = vand.u32 4294901760, %v5751_v49 }
 0x28a   : > { %2446 = vmatmul.mubr.f32.vlgmr.msra.gmra.mrb[4].mxu1 %v7079_v39 }
 0x28b   : > { %2457 = vmatpush1.msra.mxu1 %v7099_v36  ;;  %2520 = vmatprep.mubr.f32.mxu1 %v6599_v2 }
 0x28c   : > { %2530 = vmatprep.subr.mxu1 %v7064_v22 }
 0x28e   : > { %4924 = vmatmul.mubr.f32.vlgmr.msra.gmra.mrb[0].mxu0 %v7105_v37 }
 0x28f   : > { %4935 = vmatpush1.msra.mxu0 %v4855_v1  ;;  %4998 = vmatprep.mubr.f32.mxu0 %v6599_v2 }
 0x290   : > { %5008 = vmatprep.subr.mxu0 %v7086_v31 }
 0x292   : > { %2523 = vmatmul.mubr.f32.vlgmr.msra.gmra.mrb[4].mxu1 %v7091_v63 }
 0x293   : > { %2532 = vmatpush1.msra.mxu1 %v7084_v44  ;;  %2595 = vmatprep.mubr.f32.mxu1 %v6599_v2 }
 0x294   : > { %2608 = vmatprep.subr.mxu1 %v2372_v61  ;;  %v5340_v61 = vsub.f32 %v5338_v21, %v5339_v29 }
 0x296   : > { %5001 = vmatmul.mubr.f32.vlgmr.msra.gmra.mrb[0].mxu0 %v7114_v42  ;;  %v5341_v17 = vand.u32 4294901760, %v5340_v61 }
 0x297   : > { %5010 = vmatpush1.msra.mxu0 %v7109_v25  ;;  %5073 = vmatprep.mubr.f32.mxu0 %v6599_v2 }
 0x298   : > { %5086 = vmatprep.subr.mxu0 %v4850_v26 }
 0x29a   : > { %2599 = vmatmul.mubr.f32.vlgmr.msra.gmra.mrb[4].mxu1 %v2361_v11 }
 0x29b   : > { %2612 = vmatpush1.msra.mxu1 %v2378_v34  ;;  %2675 = vmatprep.mubr.f32.mxu1 %v6599_v2 }
 0x29c   : > { %2684 = vmatprep.subr.mxu1 %v7064_v22  ;;  %v2862_v22 = vsub.f32 %v7175_v6, %v2861_v14 }
 0x29e   : > { %5077 = vmatmul.mubr.f32.vlgmr.msra.gmra.mrb[0].mxu0 %v4839_v48  ;;  %v2863_v40 = vand.u32 4294901760, %v2862_v22 }
 0x29f   : > { %5090 = vmatpush1.msra.mxu0 %v4856_v52  ;;  %5153 = vmatprep.mubr.f32.mxu0 %v6599_v2 }
 0x2a0   : > { %5162 = vmatprep.subr.mxu0 %v7086_v31  ;;  %v2880_v31 = vand.u32 4294901760, %v2879_v4 }
 0x2a2   : > { %2677 = vmatmul.mubr.f32.vlgmr.msra.gmra.mrb[4].mxu1 %v7079_v39 }
 0x2a3   : > { %2686 = vmatpush1.msra.mxu1 %v7084_v44  ;;  %2749 = vmatprep.mubr.f32.mxu1 %v6599_v2  ;;  %v5356_v44 = vand.u32 4294901760, %v5355_v23 }
 0x2a4   : > { %2793 = vmatprep.subr.mxu1 %v7149_v56 }
 0x2a5   : > { %v5357_v63 = vsub.f32 %v5355_v23, %v5356_v44 }
 0x2a6   : > { %5155 = vmatmul.mubr.f32.vlgmr.msra.gmra.mrb[0].mxu0 %v7105_v37 }
 0x2a7   : > { %5164 = vmatpush1.msra.mxu0 %v7109_v25  ;;  %5227 = vmatprep.mubr.f32.mxu0 %v6599_v2  ;;  %v5358_v36 = vand.u32 4294901760, %v5357_v63  ;;  %v5827_v25 = vsub.f32 %v5751_v49, %v5826_v51 }
 0x2a8   : > { %5271 = vmatprep.subr.mxu0 %v7170_v30 }
 0x2a9   : > { %v5828_v12 = vand.u32 4294901760, %v5827_v25 }
 0x2aa   : > { %2751 = vmatmul.mubr.f32.vlgmr.msra.gmra.mrb[4].mxu1 %v7079_v39  ;;  %v5352_v39 = vand.u32 4294901760, %v5351_v0 }
 0x2ab   : > { %2795 = vmatpush1.msra.mxu1 %v7168_v20  ;;  %2858 = vmatprep.mubr.f32.mxu1 %v6599_v2  ;;  %v5829_v32 = vsub.f32 %v5827_v25, %v5828_v12 }
 0x2ac   : > { %2875 = vmatprep.subr.mxu1 %v2874_v50 }
 0x2ad   : > { %v5830_v3 = vand.u32 4294901760, %v5829_v32 }
 0x2ae   : > { %5229 = vmatmul.mubr.f32.vlgmr.msra.gmra.mrb[0].mxu0 %v7105_v37 }
 0x2af   : > { %5273 = vmatpush1.msra.mxu0 %v7191_v15  ;;  %5336 = vmatprep.mubr.f32.mxu0 %v6599_v2 }
 0x2b0   : > { %5353 = vmatprep.subr.mxu0 %v5352_v39 }
 0x2b2   : > { %2864 = vmatmul.mubr.f32.vlgmr.msra.gmra.mrb[4].mxu1 %v2863_v40 }
 0x2b3   : > { %2881 = vmatpush1.msra.mxu1 %v2880_v31  ;;  %2944 = vmatprep.mubr.f32.mxu1 %v6599_v2 }
 0x2b4   : > { %2954 = vmatprep.subr.mxu1 %v7159_v57 }
 0x2b6   : > { %5342 = vmatmul.mubr.f32.vlgmr.msra.gmra.mrb[0].mxu0 %v5341_v17 }
 0x2b7   : > { %5359 = vmatpush1.msra.mxu0 %v5358_v36  ;;  %5422 = vmatprep.mubr.f32.mxu0 %v6599_v2 }
 0x2b8   : > { %5432 = vmatprep.subr.mxu0 %v5349_v9 }
 0x2ba   : > { %2946 = vmatmul.mubr.f32.vlgmr.msra.gmra.mrb[4].mxu1 %v7163_v62 }
 0x2bb   : > { %2957 = vmatpush1.msra.mxu1 %v2877_v7  ;;  %3020 = vmatprep.mubr.f32.mxu1 %v6599_v2 }
 0x2bc   : > { %3030 = vmatprep.subr.mxu1 %v7149_v56 }
 0x2be   : > { %5424 = vmatmul.mubr.f32.vlgmr.msra.gmra.mrb[0].mxu0 %v7187_v10 }
 0x2bf   : > { %5435 = vmatpush1.msra.mxu0 %v5355_v23  ;;  %5498 = vmatprep.mubr.f32.mxu0 %v6599_v2 }
 0x2c0   : > { %5508 = vmatprep.subr.mxu0 %v7170_v30 }
 0x2c2   : > { %3023 = vmatmul.mubr.f32.vlgmr.msra.gmra.mrb[4].mxu1 %v7175_v6 }
 0x2c3   : > { %3032 = vmatpush1.msra.mxu1 %v7168_v20  ;;  %3095 = vmatprep.mubr.f32.mxu1 %v6599_v2 }
 0x2c4   : > { %3108 = vmatprep.subr.mxu1 %v2872_v28 }
 0x2c6   : > { %5501 = vmatmul.mubr.f32.vlgmr.msra.gmra.mrb[0].mxu0 %v5338_v21 }
 0x2c7   : > { %5510 = vmatpush1.msra.mxu0 %v7191_v15  ;;  %5573 = vmatprep.mubr.f32.mxu0 %v6599_v2 }
 0x2c8   : > { %5586 = vmatprep.subr.mxu0 %v5350_v33 }
 0x2ca   : > { %3099 = vmatmul.mubr.f32.vlgmr.msra.gmra.mrb[4].mxu1 %v2861_v14 }
 0x2cb   : > { %3112 = vmatpush1.msra.mxu1 %v2878_v18  ;;  %3175 = vmatprep.mubr.f32.mxu1 %v6599_v2 }
 0x2cc   : > { %3184 = vmatprep.subr.mxu1 %v7149_v56 }
 0x2ce   : > { %5577 = vmatmul.mubr.f32.vlgmr.msra.gmra.mrb[0].mxu0 %v5339_v29 }
 0x2cf   : > { %5590 = vmatpush1.msra.mxu0 %v5356_v44  ;;  %5653 = vmatprep.mubr.f32.mxu0 %v6599_v2 }
 0x2d0   : > { %5662 = vmatprep.subr.mxu0 %v7170_v30  ;;  %v5739_v34 = vpop.permute.xlu0 %5738 }
 0x2d2   : > { %3177 = vmatmul.mubr.f32.vlgmr.msra.gmra.mrb[4].mxu1 %v7163_v62 }
 0x2d3   : > { %3186 = vmatpush1.msra.mxu1 %v7168_v20  ;;  %3249 = vmatprep.mubr.f32.mxu1 %v6599_v2 }
 0x2d6   : > { %5655 = vmatmul.mubr.f32.vlgmr.msra.gmra.mrb[0].mxu0 %v7187_v10 }
 0x2d7   : > { %5664 = vmatpush1.msra.mxu0 %v7191_v15  ;;  %5727 = vmatprep.mubr.f32.mxu0 %v6599_v2 }
 0x2da   : > { %3251 = vmatmul.mubr.f32.vlgmr.msra.gmra.mrb[4].mxu1 %v7163_v62  ;;  %v5748_v62 = vpop.permute.xlu1 %5747 }
 0x2db   : > { %v6331_v5 = vadd.f32 %v5748_v62, %v6745_v59  ;;  %v6333_v20 = vadd.f32 %v5748_v62, %v6747_v60 }
 0x2de   : > { %5729 = vmatmul.mubr.f32.vlgmr.msra.gmra.mrb[0].mxu0 %v7187_v10 }
 0x2df   : > { %5825 = vmatprep.mubr.f32.mxu0 %v6599_v2 }
 0x3ad   : > { %v3252_v37 = vpop.f32.mrb[4].mxu1 }
 0x3ae   : > { %v3254_v11 = vpop.f32.mrb[5].mxu1 }
 0x3b1   : > { %v5730_v26 = vpop.f32.mrb[0].mxu0 }
 0x3b2   : > { %v6337_v42 = vadd.f32 %v5730_v26, %v3252_v37  ;;  %v5732_v16 = vpop.f32.mrb[1].mxu0 }
 0x3b3   : > { %v6338_v1 = vadd.f32 %v5732_v16, %v3254_v11 }
 0x3b4   : > { %v5741_v27 = vadd.f32 %v6337_v42, %v5739_v34 }
 0x3b5   : > { %v5742_v24 = vadd.f32 %v6338_v1, %v5739_v34 }
 0x3b6   : > { %v5743_v48 = vmax.f32 %v5741_v27, 0.0 }
 0x3b7   : > { %v5744_v52 = vmax.f32 %v5742_v24, 0.0 }
 0x3b8   : > { %v5754_v41 = vsel %vm286_vm1, %v5743_v48, 0 }
 0x3b9   : > { %v5757_v45 = vsel %vm286_vm1, %v5744_v52, 0  ;;  %v5761_v38 = vand.u32 4294901760, %v5754_v41 }
 0x3ba   : > { %v5759_v19 = vand.u32 4294901760, %v5757_v45 }
 0x3bb   : > { %v5844_v54 = vsub.f32 %v5754_v41, %v5761_v38 }
 0x3bc   : > { %v5838_v53 = vsub.f32 %v5757_v45, %v5759_v19  ;;  %5760 = vmatprep.subr.mxu0 %v5759_v19 }
 0x3bd   : > { %v5845_v55 = vand.u32 4294901760, %v5844_v54  ;;  %5762 = vmatpush1.msra.mxu0 %v5761_v38 }
 0x3be   : > { %5831 = vmatmul.mubr.f32.vlgmr.msra.gmra.mrb[2].mxu0 %v5830_v3  ;;  %v5839_v56 = vand.u32 4294901760, %v5838_v53 }
 0x3bf   : > { %v5846_v47 = vsub.f32 %v5844_v54, %v5845_v55  ;;  %5911 = vmatprep.mubr.f32.mxu0 %v6599_v2 }
 0x3c0   : > { %v5840_v43 = vsub.f32 %v5838_v53, %v5839_v56 }
 0x3c1   : > { %v5847_v58 = vand.u32 4294901760, %v5846_v47 }
 0x3c2   : > { %v5841_v57 = vand.u32 4294901760, %v5840_v43 }
 0x3c4   : > { %5842 = vmatprep.subr.mxu0 %v5841_v57 }
 0x3c5   : > { %5848 = vmatpush1.msra.mxu0 %v5847_v58 }
 0x3c6   : > { %5913 = vmatmul.mubr.f32.vlgmr.msra.gmra.mrb[2].mxu0 %v5826_v51  ;;  %5921 = vmatprep.subr.mxu0 %v5838_v53 }
 0x3c7   : > { %5924 = vmatpush1.msra.mxu0 %v5844_v54  ;;  %5987 = vmatprep.mubr.f32.mxu0 %v6599_v2 }
 0x3c8   : > { %5997 = vmatprep.subr.mxu0 %v5759_v19 }
 0x3ce   : > { %5990 = vmatmul.mubr.f32.vlgmr.msra.gmra.mrb[2].mxu0 %v5827_v25 }
 0x3cf   : > { %5999 = vmatpush1.msra.mxu0 %v5761_v38  ;;  %6062 = vmatprep.mubr.f32.mxu0 %v6599_v2 }
 0x3d0   : > { %6075 = vmatprep.subr.mxu0 %v5839_v56 }
 0x3d6   : > { %6066 = vmatmul.mubr.f32.vlgmr.msra.gmra.mrb[2].mxu0 %v5828_v12 }
 0x3d7   : > { %6079 = vmatpush1.msra.mxu0 %v5845_v55  ;;  %6142 = vmatprep.mubr.f32.mxu0 %v6599_v2 }
 0x3d8   : > { %6151 = vmatprep.subr.mxu0 %v5759_v19 }
 0x3de   : > { %6144 = vmatmul.mubr.f32.vlgmr.msra.gmra.mrb[2].mxu0 %v5826_v51 }
 0x3df   : > { %6153 = vmatpush1.msra.mxu0 %v5761_v38  ;;  %6216 = vmatprep.mubr.f32.mxu0 %v6599_v2 }
 0x3e6   : > { %6218 = vmatmul.mubr.f32.vlgmr.msra.gmra.mrb[2].mxu0 %v5826_v51 }
 0x4b9   : > { %v6219_v30 = vpop.f32.mrb[2].mxu0 }
 0x4ba   : > { %v6332_v28 = vadd.f32 %v6331_v5, %v6219_v30  ;;  %v6221_v6 = vpop.f32.mrb[3].mxu0 }
 0x4bb   : > { %v6334_v35 = vadd.f32 %v6333_v20, %v6221_v6 }
 0x4bc   : > { %6226 = vst [vmem:[%s271_s15] sm:$0xff] %v6332_v28 }
 0x4bd   : > { %6227 = vst [vmem:[%s271_s15 + $0x8] sm:$0xff] %v6334_v35 }
 0x4be   : > { %6547 = shalt.err (!%p6544_p3)
}
 0x4bf   : > { %s6548_s29 = scalar_lea.hbm %s7251_s19, 256  ;;  %s6552_s13 = scalar_lea.hbm %s7300_s7, 512 }
 0x4c0   : > { %p6549_p4 = scmp.ne.s32.totalorder %s7251_s19, %s6548_s29  ;;  %p6553_p9 = scmp.lt.u32.totalorder %s7251_s19, %s7300_s7 }
 0x4c1   : > { %p6554_p10 = scmp.lt.u32.totalorder %s6552_s13, %s6548_s29  ;;  %p6556_p12 = scmp.lt.u32.totalorder %s6548_s29, %s7251_s19 }
 0x4c2   : > { %p6550_p7 = pnand %p6549_p4, %p6692_p5 }
 0x4c3   : > { %p6555_p11 = por %p6554_p10, %p6553_p9 }
 0x4c4   : > { %p6551_p8 = pneg %p6550_p7 }
 0x4c5   : > { %p6557_p13 = por %p6556_p12, %p6555_p11 }
 0x4c7   : > { %p6558_p0 = pnand %p6557_p13, %p6551_p8 }
 0x4c9   : > { %6561 = shalt.err (!%p6558_p0)
}
 0x4ca   : > { %6473 = dma.vmem_to_hbm [thread:$0]  (%p6692_p5), %s7253_s16, 256, %s7251_s19, %s6229_s28  }
 0x4cb PF: > { %p6479_p1 = scmp.ge.s32.totalorder %s6596_s27, 2  ;;  %s6255_s17 = sand.u32 1, %s6584_s24  }
 0x4cc   : > { %s6256_s18 = scalar_lea.sflag [#allocation3], %s6255_s17 }
 0x4cd   : > { %p6476_p2 = pnand %p6479_p1, %p6696_p6 }
 0x4cf   : > { %6579 = dma.done.wait (!%p6476_p2), %s6256_s18, 256  }
 0x4d0   : > { %6581 = vsyncadd (!%p6476_p2), %s6256_s18, 4294967040  ;;  %p17_p3 = scmp.ge.s32.totalorder %s6679_s30, 4   ;;  %s7303_s24 = smov %s6588_s25 }
 0x4d1   : > { %s7304_s25 = smov %s6592_s26  ;;  %s7305_s26 = smov %s6690_s10 }
 0x4d2   : > { %s7306_s27 = smov %s6679_s30  ;;  %19 = sbr.rel (!%p17_p3) target bundleno = 3 (0x3), region = 98 }
 0x4d9   :  { %6261 = vsyncpa [#allocation3], 1 }
 0x4da   :  { %6263 = vsyncpa [#allocation3 + $0x1], 1 }

</bundles_post_ra>
